<compile_context>
chip_gen: v7x
topology: tpu7x:2x2x1
jax: 0.10.0
libtpu: 0.0.40
codegen_flags: <defaults>
</compile_context>

<pallas_src>
import functools

import jax
import jax.numpy as jnp
from jax.experimental import pallas as pl
from jax.experimental.pallas import tpu as pltpu

INPUT = 10
HIDDEN = 64
OUT = 10


def _lstm_kws_kernel(x_ref, w0_ref, b0_ref, w1_ref, b1_ref, wout_ref, bout_ref,
                     out_ref, xh0_buf, hh1_buf, *, use_bf16):
    Bc, T, D = x_ref.shape
    H = HIDDEN
    cdt = jnp.bfloat16 if use_bf16 else jnp.float32

    # Hoist weight loads / casts and bias broadcasts out of the recurrence.
    w0 = w0_ref[...].astype(cdt)                      # (D + H, 4H)
    w1 = w1_ref[...].astype(cdt)                      # (2H, 4H)
    b0 = jnp.broadcast_to(b0_ref[...], (Bc, 4 * H))   # (Bc, 4H), broadcast once
    b1 = jnp.broadcast_to(b1_ref[...], (Bc, 4 * H))

    h0 = jnp.zeros((Bc, H), jnp.float32)
    c0 = jnp.zeros((Bc, H), jnp.float32)
    h1 = jnp.zeros((Bc, H), jnp.float32)
    c1 = jnp.zeros((Bc, H), jnp.float32)

    def cell(fused_in, c, w, b):
        # fused_in: [x | h] in compute dtype; one MXU matmul per cell.
        gates = jnp.dot(fused_in, w, preferred_element_type=jnp.float32) + b
        # Gate column order [i | f | o | g]: one contiguous sigmoid, one tanh.
        sig = jax.nn.sigmoid(gates[:, :3 * H])
        g = jnp.tanh(gates[:, 3 * H:])
        i = sig[:, :H]
        f = sig[:, H:2 * H]
        o = sig[:, 2 * H:3 * H]
        c_new = f * c + i * g
        h_new = o * jnp.tanh(c_new)
        return h_new, c_new

    # Unrolled (static-T) recurrence; h/c state lives in vregs.
    # TODO(synk): for very long sequences, chunk T over an "arbitrary" grid axis with
    # scratch-carried state to bound trace size.
    for t in range(T):
        # Layer 0: assemble [x_t | h0] in a lane-dense staging buffer (static slices).
        xh0_buf[:, :D] = x_ref[:, t, :]
        xh0_buf[:, D:] = h0
        h0, c0 = cell(xh0_buf[...].astype(cdt), c0, w0, b0)

        # Layer 1: assemble [h0 | h1] (K = 128).
        hh1_buf[:, :H] = h0
        hh1_buf[:, H:] = h1
        h1, c1 = cell(hh1_buf[...].astype(cdt), c1, w1, b1)

    logits = (jnp.dot(h1, wout_ref[...], preferred_element_type=jnp.float32)
              + bout_ref[...])
    out_ref[...] = logits.astype(out_ref.dtype)


def _round_up(n, m):
    return ((n + m - 1) // m) * m


@functools.partial(jax.jit, static_argnames=("use_bf16", "batch_block"))
def lstm_kws_forward(x, packed_params, *, use_bf16=False, batch_block=128):
    """x: (B, T, INPUT) float32, batch_first like PyTorch.  Returns (B, OUT) float32."""
    B, T, D = x.shape
    assert D == INPUT
    w0, b0, w1, b1, wout, bout = packed_params

    # Pad batch to a sublane multiple (8) and split into independent "parallel" chunks.
    b8 = _round_up(max(B, 1), 8)
    bc = min(batch_block, b8)
    b_pad = _round_up(B, bc)
    if b_pad != B:
        x = jnp.pad(x, ((0, b_pad - B), (0, 0), (0, 0)))

    full = lambda a: pl.BlockSpec(a.shape, lambda i: (0,) * a.ndim)
    kernel = functools.partial(_lstm_kws_kernel, use_bf16=use_bf16)

    out = pl.pallas_call(
        kernel,
        out_shape=jax.ShapeDtypeStruct((b_pad, OUT), jnp.float32),
        grid_spec=pltpu.PrefetchScalarGridSpec(
            num_scalar_prefetch=0,
            grid=(b_pad // bc,),
            in_specs=[
                pl.BlockSpec((bc, T, D), lambda i: (i, 0, 0)),   # x (batch chunk)
                full(w0), full(b0), full(w1), full(b1), full(wout), full(bout),
            ],
            out_specs=pl.BlockSpec((bc, OUT), lambda i: (i, 0)),
            scratch_shapes=[
                pltpu.VMEM((bc, INPUT + HIDDEN), jnp.float32),   # [x_t | h0] staging
                pltpu.VMEM((bc, 2 * HIDDEN), jnp.float32),       # [h0  | h1] staging
            ],
        ),
        compiler_params=pltpu.CompilerParams(
            dimension_semantics=("parallel",)),
    )(x, w0, b0, w1, b1, wout, bout)
    return out[:B]


def init_params_torch_layout(key):
    """PyTorch-layout params: weight_ih_l{k} (4H,in), weight_hh_l{k} (4H,H),
    bias_ih/bias_hh (4H,), gate order [i,f,g,o]; Linear weight (OUT,H), bias (OUT,)."""
    H = HIDDEN
    ks = jax.random.split(key, 10)
    bound = 1.0 / (H ** 0.5)
    u = lambda k, shape: jax.random.uniform(k, shape, jnp.float32, -bound, bound)
    wih0 = u(ks[0], (4 * H, INPUT))
    whh0 = u(ks[1], (4 * H, H))
    bih0 = u(ks[2], (4 * H,))
    bhh0 = u(ks[3], (4 * H,))
    wih1 = u(ks[4], (4 * H, H))
    whh1 = u(ks[5], (4 * H, H))
    bih1 = u(ks[6], (4 * H,))
    bhh1 = u(ks[7], (4 * H,))
    wout = u(ks[8], (OUT, H))
    bout = u(ks[9], (OUT,))
    return (wih0, whh0, bih0, bhh0, wih1, whh1, bih1, bhh1, wout, bout)


def pack_params(torch_params):
    """Pack for the kernel: per layer W = vstack(W_ih.T, W_hh.T) with gate columns
    permuted from PyTorch [i,f,g,o] to [i,f,o,g]; bias = (b_ih + b_hh) permuted.
    Output Linear stored transposed."""
    (wih0, whh0, bih0, bhh0, wih1, whh1, bih1, bhh1, wout, bout) = torch_params
    H = HIDDEN
    perm = jnp.concatenate([jnp.arange(0, 2 * H),        # i, f
                            jnp.arange(3 * H, 4 * H),    # o
                            jnp.arange(2 * H, 3 * H)])   # g

    def pack_layer(wih, whh, bih, bhh):
        w = jnp.concatenate([wih.T, whh.T], axis=0)[:, perm]
        b = (bih + bhh)[perm].reshape(1, 4 * H)
        return w, b

    w0, b0 = pack_layer(wih0, whh0, bih0, bhh0)   # (D+H, 4H), (1, 4H)
    w1, b1 = pack_layer(wih1, whh1, bih1, bhh1)   # (2H, 4H),  (1, 4H)
    return (w0, b0, w1, b1, wout.T, bout.reshape(1, OUT))


def reference_forward(x, torch_params):
    """Pure-JAX mirror of the PyTorch module (gate order i,f,g,o, zero init state)."""
    (wih0, whh0, bih0, bhh0, wih1, whh1, bih1, bhh1, wout, bout) = torch_params
    B, T, _ = x.shape
    H = HIDDEN

    def cell(xt, h, c, wih, whh, bih, bhh):
        gates = xt @ wih.T + h @ whh.T + bih + bhh
        i = jax.nn.sigmoid(gates[:, 0 * H:1 * H])
        f = jax.nn.sigmoid(gates[:, 1 * H:2 * H])
        g = jnp.tanh(gates[:, 2 * H:3 * H])
        o = jax.nn.sigmoid(gates[:, 3 * H:4 * H])
        c = f * c + i * g
        h = o * jnp.tanh(c)
        return h, c

    h0 = c0 = h1 = c1 = jnp.zeros((B, H), jnp.float32)
    for t in range(T):
        h0, c0 = cell(x[:, t, :], h0, c0, wih0, whh0, bih0, bhh0)
        h1, c1 = cell(h0, h1, c1, wih1, whh1, bih1, bhh1)
    return h1 @ wout.T + bout


if __name__ == "__main__":
    key = jax.random.PRNGKey(0)
    k_x, k_p = jax.random.split(key)

    B, T = 2, 8
    x = jax.random.normal(k_x, (B, T, INPUT), jnp.float32)
    torch_params = init_params_torch_layout(k_p)
    packed = pack_params(torch_params)

    ref = reference_forward(x, torch_params)

    # f32 path (exact PyTorch semantics, tight tolerance).
    out = jax.block_until_ready(lstm_kws_forward(x, packed))
    assert out.shape == (B, OUT)
    assert jnp.allclose(out, ref, rtol=1e-5, atol=1e-5), (out, ref)

    # bf16 MXU-operand path (v6e / v7x); f32 accumulation, loose tolerance sanity check.
    out_bf16 = jax.block_until_ready(lstm_kws_forward(x, packed, use_bf16=True))
    assert out_bf16.shape == (B, OUT)
    assert float(jnp.max(jnp.abs(out_bf16 - ref))) < 0.25

    print("KERNEL_OK")
</pallas_src>

<mosaic_0001>
module attributes {stable_mosaic.version = 11 : i64} {
  func.func @_lstm_kws_kernel(%arg0: i32, %arg1: memref<8x8x10xf32, #tpu.memory_space<vmem>>, %arg2: memref<74x256xf32, #tpu.memory_space<vmem>>, %arg3: memref<1x256xf32, #tpu.memory_space<vmem>>, %arg4: memref<128x256xf32, #tpu.memory_space<vmem>>, %arg5: memref<1x256xf32, #tpu.memory_space<vmem>>, %arg6: memref<64x10xf32, #tpu.memory_space<vmem>>, %arg7: memref<1x10xf32, #tpu.memory_space<vmem>>, %arg8: memref<8x10xf32, #tpu.memory_space<vmem>>, %arg9: memref<8x74xf32, #tpu.memory_space<vmem>>, %arg10: memref<8x128xf32, #tpu.memory_space<vmem>>) attributes {dimension_semantics = [#tpu.dimension_semantics<parallel>], iteration_bounds = array<i64: 1>, scalar_prefetch = 0 : i64, scratch_operands = 2 : i64, tpu.core_type = #tpu.core_type<tc>, window_params = [{transform_indices = @transform_0, window_bounds = array<i64: 8, 8, 10>}, {pipeline_mode = #tpu.pipeline_mode<synchronous>, transform_indices = @transform_1, window_bounds = array<i64: 74, 256>}, {pipeline_mode = #tpu.pipeline_mode<synchronous>, transform_indices = @transform_2, window_bounds = array<i64: 1, 256>}, {pipeline_mode = #tpu.pipeline_mode<synchronous>, transform_indices = @transform_3, window_bounds = array<i64: 128, 256>}, {pipeline_mode = #tpu.pipeline_mode<synchronous>, transform_indices = @transform_4, window_bounds = array<i64: 1, 256>}, {pipeline_mode = #tpu.pipeline_mode<synchronous>, transform_indices = @transform_5, window_bounds = array<i64: 64, 10>}, {pipeline_mode = #tpu.pipeline_mode<synchronous>, transform_indices = @transform_6, window_bounds = array<i64: 1, 10>}, {transform_indices = @transform_7, window_bounds = array<i64: 8, 10>}]} {
    %c0 = arith.constant 0 : index
    %c0_0 = arith.constant 0 : index
    %0 = vector.load %arg2[%c0, %c0_0] : memref<74x256xf32, #tpu.memory_space<vmem>>, vector<74x256xf32>
    %c0_1 = arith.constant 0 : index
    %c0_2 = arith.constant 0 : index
    %1 = vector.load %arg4[%c0_1, %c0_2] : memref<128x256xf32, #tpu.memory_space<vmem>>, vector<128x256xf32>
    %c0_3 = arith.constant 0 : index
    %c0_4 = arith.constant 0 : index
    %2 = vector.load %arg3[%c0_3, %c0_4] : memref<1x256xf32, #tpu.memory_space<vmem>>, vector<1x256xf32>
    %3 = vector.shape_cast %2 : vector<1x256xf32> to vector<1x256xf32>
    %4 = vector.broadcast %3 : vector<1x256xf32> to vector<8x256xf32>
    %c0_5 = arith.constant 0 : index
    %c0_6 = arith.constant 0 : index
    %5 = vector.load %arg5[%c0_5, %c0_6] : memref<1x256xf32, #tpu.memory_space<vmem>>, vector<1x256xf32>
    %6 = vector.shape_cast %5 : vector<1x256xf32> to vector<1x256xf32>
    %7 = vector.broadcast %6 : vector<1x256xf32> to vector<8x256xf32>
    %cst = arith.constant 0.000000e+00 : f32
    %8 = vector.broadcast %cst : f32 to vector<8x64xf32>
    %cst_7 = arith.constant 0.000000e+00 : f32
    %9 = vector.broadcast %cst_7 : f32 to vector<8x64xf32>
    %cst_8 = arith.constant 0.000000e+00 : f32
    %10 = vector.broadcast %cst_8 : f32 to vector<8x64xf32>
    %cst_9 = arith.constant 0.000000e+00 : f32
    %11 = vector.broadcast %cst_9 : f32 to vector<8x64xf32>
    %c0_10 = arith.constant 0 : index
    %c0_11 = arith.constant 0 : index
    %c0_12 = arith.constant 0 : index
    %12 = vector.load %arg1[%c0_10, %c0_11, %c0_12] : memref<8x8x10xf32, #tpu.memory_space<vmem>>, vector<8x1x10xf32>
    %13 = vector.shape_cast %12 : vector<8x1x10xf32> to vector<8x10xf32>
    %c0_13 = arith.constant 0 : index
    %c0_14 = arith.constant 0 : index
    %14 = vector.load %arg9[%c0_13, %c0_14] : memref<8x74xf32, #tpu.memory_space<vmem>>, vector<8x10xf32>
    tpu.vector_store %arg9[%c0_13, %c0_14], %13 {strides = array<i32>} : memref<8x74xf32, #tpu.memory_space<vmem>>, vector<8x10xf32>,
    %c0_15 = arith.constant 0 : index
    %c10 = arith.constant 10 : index
    %15 = vector.load %arg9[%c0_15, %c10] : memref<8x74xf32, #tpu.memory_space<vmem>>, vector<8x64xf32>
    tpu.vector_store %arg9[%c0_15, %c10], %8 {strides = array<i32>} : memref<8x74xf32, #tpu.memory_space<vmem>>, vector<8x64xf32>,
    %c0_16 = arith.constant 0 : index
    %c0_17 = arith.constant 0 : index
    %16 = vector.load %arg9[%c0_16, %c0_17] : memref<8x74xf32, #tpu.memory_space<vmem>>, vector<8x74xf32>
    %cst_18 = arith.constant dense<0.000000e+00> : vector<8x256xf32>
    %17 = tpu.matmul %16, %0, %cst_18 {dimension_numbers = #tpu.dot_dimension_numbers<[1], [0], [0], [1], [0, 0, 1, 1], [], []>} : vector<8x74xf32>, vector<74x256xf32>, vector<8x256xf32> -> vector<8x256xf32>
    %18 = arith.addf %17, %4 : vector<8x256xf32>
    %19 = vector.extract_strided_slice %18 {offsets = [0, 0], sizes = [8, 192], strides = [1, 1]} : vector<8x256xf32> to vector<8x192xf32>
    %20 = arith.negf %19 : vector<8x192xf32>
    %21 = math.exp %20 : vector<8x192xf32>
    %cst_19 = arith.constant 1.000000e+00 : f32
    %22 = vector.broadcast %cst_19 : f32 to vector<8x192xf32>
    %23 = arith.addf %22, %21 : vector<8x192xf32>
    %24 = arith.divf %22, %23 : vector<8x192xf32>
    %25 = vector.extract_strided_slice %18 {offsets = [0, 192], sizes = [8, 64], strides = [1, 1]} : vector<8x256xf32> to vector<8x64xf32>
    %26 = math.tanh %25 : vector<8x64xf32>
    %27 = vector.extract_strided_slice %24 {offsets = [0, 0], sizes = [8, 64], strides = [1, 1]} : vector<8x192xf32> to vector<8x64xf32>
    %28 = vector.extract_strided_slice %24 {offsets = [0, 64], sizes = [8, 64], strides = [1, 1]} : vector<8x192xf32> to vector<8x64xf32>
    %29 = vector.extract_strided_slice %24 {offsets = [0, 128], sizes = [8, 64], strides = [1, 1]} : vector<8x192xf32> to vector<8x64xf32>
    %30 = arith.mulf %28, %9 : vector<8x64xf32>
    %31 = arith.mulf %27, %26 : vector<8x64xf32>
    %32 = arith.addf %30, %31 : vector<8x64xf32>
    %33 = math.tanh %32 : vector<8x64xf32>
    %34 = arith.mulf %29, %33 : vector<8x64xf32>
    %c0_20 = arith.constant 0 : index
    %c0_21 = arith.constant 0 : index
    %35 = vector.load %arg10[%c0_20, %c0_21] : memref<8x128xf32, #tpu.memory_space<vmem>>, vector<8x64xf32>
    tpu.vector_store %arg10[%c0_20, %c0_21], %34 {strides = array<i32>} : memref<8x128xf32, #tpu.memory_space<vmem>>, vector<8x64xf32>,
    %c0_22 = arith.constant 0 : index
    %c64 = arith.constant 64 : index
    %36 = vector.load %arg10[%c0_22, %c64] : memref<8x128xf32, #tpu.memory_space<vmem>>, vector<8x64xf32>
    tpu.vector_store %arg10[%c0_22, %c64], %10 {strides = array<i32>} : memref<8x128xf32, #tpu.memory_space<vmem>>, vector<8x64xf32>,
    %c0_23 = arith.constant 0 : index
    %c0_24 = arith.constant 0 : index
    %37 = vector.load %arg10[%c0_23, %c0_24] : memref<8x128xf32, #tpu.memory_space<vmem>>, vector<8x128xf32>
    %cst_25 = arith.constant dense<0.000000e+00> : vector<8x256xf32>
    %38 = tpu.matmul %37, %1, %cst_25 {dimension_numbers = #tpu.dot_dimension_numbers<[1], [0], [0], [1], [0, 0, 1, 1], [], []>} : vector<8x128xf32>, vector<128x256xf32>, vector<8x256xf32> -> vector<8x256xf32>
    %39 = arith.addf %38, %7 : vector<8x256xf32>
    %40 = vector.extract_strided_slice %39 {offsets = [0, 0], sizes = [8, 192], strides = [1, 1]} : vector<8x256xf32> to vector<8x192xf32>
    %41 = arith.negf %40 : vector<8x192xf32>
    %42 = math.exp %41 : vector<8x192xf32>
    %cst_26 = arith.constant 1.000000e+00 : f32
    %43 = vector.broadcast %cst_26 : f32 to vector<8x192xf32>
    %44 = arith.addf %43, %42 : vector<8x192xf32>
    %45 = arith.divf %43, %44 : vector<8x192xf32>
    %46 = vector.extract_strided_slice %39 {offsets = [0, 192], sizes = [8, 64], strides = [1, 1]} : vector<8x256xf32> to vector<8x64xf32>
    %47 = math.tanh %46 : vector<8x64xf32>
    %48 = vector.extract_strided_slice %45 {offsets = [0, 0], sizes = [8, 64], strides = [1, 1]} : vector<8x192xf32> to vector<8x64xf32>
    %49 = vector.extract_strided_slice %45 {offsets = [0, 64], sizes = [8, 64], strides = [1, 1]} : vector<8x192xf32> to vector<8x64xf32>
    %50 = vector.extract_strided_slice %45 {offsets = [0, 128], sizes = [8, 64], strides = [1, 1]} : vector<8x192xf32> to vector<8x64xf32>
    %51 = arith.mulf %49, %11 : vector<8x64xf32>
    %52 = arith.mulf %48, %47 : vector<8x64xf32>
    %53 = arith.addf %51, %52 : vector<8x64xf32>
    %54 = math.tanh %53 : vector<8x64xf32>
    %55 = arith.mulf %50, %54 : vector<8x64xf32>
    %c0_27 = arith.constant 0 : index
    %c1 = arith.constant 1 : index
    %c0_28 = arith.constant 0 : index
    %56 = vector.load %arg1[%c0_27, %c1, %c0_28] : memref<8x8x10xf32, #tpu.memory_space<vmem>>, vector<8x1x10xf32>
    %57 = vector.shape_cast %56 : vector<8x1x10xf32> to vector<8x10xf32>
    %c0_29 = arith.constant 0 : index
    %c0_30 = arith.constant 0 : index
    %58 = vector.load %arg9[%c0_29, %c0_30] : memref<8x74xf32, #tpu.memory_space<vmem>>, vector<8x10xf32>
    tpu.vector_store %arg9[%c0_29, %c0_30], %57 {strides = array<i32>} : memref<8x74xf32, #tpu.memory_space<vmem>>, vector<8x10xf32>,
    %c0_31 = arith.constant 0 : index
    %c10_32 = arith.constant 10 : index
    %59 = vector.load %arg9[%c0_31, %c10_32] : memref<8x74xf32, #tpu.memory_space<vmem>>, vector<8x64xf32>
    tpu.vector_store %arg9[%c0_31, %c10_32], %34 {strides = array<i32>} : memref<8x74xf32, #tpu.memory_space<vmem>>, vector<8x64xf32>,
    %c0_33 = arith.constant 0 : index
    %c0_34 = arith.constant 0 : index
    %60 = vector.load %arg9[%c0_33, %c0_34] : memref<8x74xf32, #tpu.memory_space<vmem>>, vector<8x74xf32>
    %cst_35 = arith.constant dense<0.000000e+00> : vector<8x256xf32>
    %61 = tpu.matmul %60, %0, %cst_35 {dimension_numbers = #tpu.dot_dimension_numbers<[1], [0], [0], [1], [0, 0, 1, 1], [], []>} : vector<8x74xf32>, vector<74x256xf32>, vector<8x256xf32> -> vector<8x256xf32>
    %62 = arith.addf %61, %4 : vector<8x256xf32>
    %63 = vector.extract_strided_slice %62 {offsets = [0, 0], sizes = [8, 192], strides = [1, 1]} : vector<8x256xf32> to vector<8x192xf32>
    %64 = arith.negf %63 : vector<8x192xf32>
    %65 = math.exp %64 : vector<8x192xf32>
    %cst_36 = arith.constant 1.000000e+00 : f32
    %66 = vector.broadcast %cst_36 : f32 to vector<8x192xf32>
    %67 = arith.addf %66, %65 : vector<8x192xf32>
    %68 = arith.divf %66, %67 : vector<8x192xf32>
    %69 = vector.extract_strided_slice %62 {offsets = [0, 192], sizes = [8, 64], strides = [1, 1]} : vector<8x256xf32> to vector<8x64xf32>
    %70 = math.tanh %69 : vector<8x64xf32>
    %71 = vector.extract_strided_slice %68 {offsets = [0, 0], sizes = [8, 64], strides = [1, 1]} : vector<8x192xf32> to vector<8x64xf32>
    %72 = vector.extract_strided_slice %68 {offsets = [0, 64], sizes = [8, 64], strides = [1, 1]} : vector<8x192xf32> to vector<8x64xf32>
    %73 = vector.extract_strided_slice %68 {offsets = [0, 128], sizes = [8, 64], strides = [1, 1]} : vector<8x192xf32> to vector<8x64xf32>
    %74 = arith.mulf %72, %32 : vector<8x64xf32>
    %75 = arith.mulf %71, %70 : vector<8x64xf32>
    %76 = arith.addf %74, %75 : vector<8x64xf32>
    %77 = math.tanh %76 : vector<8x64xf32>
    %78 = arith.mulf %73, %77 : vector<8x64xf32>
    %c0_37 = arith.constant 0 : index
    %c0_38 = arith.constant 0 : index
    %79 = vector.load %arg10[%c0_37, %c0_38] : memref<8x128xf32, #tpu.memory_space<vmem>>, vector<8x64xf32>
    tpu.vector_store %arg10[%c0_37, %c0_38], %78 {strides = array<i32>} : memref<8x128xf32, #tpu.memory_space<vmem>>, vector<8x64xf32>,
    %c0_39 = arith.constant 0 : index
    %c64_40 = arith.constant 64 : index
    %80 = vector.load %arg10[%c0_39, %c64_40] : memref<8x128xf32, #tpu.memory_space<vmem>>, vector<8x64xf32>
    tpu.vector_store %arg10[%c0_39, %c64_40], %55 {strides = array<i32>} : memref<8x128xf32, #tpu.memory_space<vmem>>, vector<8x64xf32>,
    %c0_41 = arith.constant 0 : index
    %c0_42 = arith.constant 0 : index
    %81 = vector.load %arg10[%c0_41, %c0_42] : memref<8x128xf32, #tpu.memory_space<vmem>>, vector<8x128xf32>
    %cst_43 = arith.constant dense<0.000000e+00> : vector<8x256xf32>
    %82 = tpu.matmul %81, %1, %cst_43 {dimension_numbers = #tpu.dot_dimension_numbers<[1], [0], [0], [1], [0, 0, 1, 1], [], []>} : vector<8x128xf32>, vector<128x256xf32>, vector<8x256xf32> -> vector<8x256xf32>
    %83 = arith.addf %82, %7 : vector<8x256xf32>
    %84 = vector.extract_strided_slice %83 {offsets = [0, 0], sizes = [8, 192], strides = [1, 1]} : vector<8x256xf32> to vector<8x192xf32>
    %85 = arith.negf %84 : vector<8x192xf32>
    %86 = math.exp %85 : vector<8x192xf32>
    %cst_44 = arith.constant 1.000000e+00 : f32
    %87 = vector.broadcast %cst_44 : f32 to vector<8x192xf32>
    %88 = arith.addf %87, %86 : vector<8x192xf32>
    %89 = arith.divf %87, %88 : vector<8x192xf32>
    %90 = vector.extract_strided_slice %83 {offsets = [0, 192], sizes = [8, 64], strides = [1, 1]} : vector<8x256xf32> to vector<8x64xf32>
    %91 = math.tanh %90 : vector<8x64xf32>
    %92 = vector.extract_strided_slice %89 {offsets = [0, 0], sizes = [8, 64], strides = [1, 1]} : vector<8x192xf32> to vector<8x64xf32>
    %93 = vector.extract_strided_slice %89 {offsets = [0, 64], sizes = [8, 64], strides = [1, 1]} : vector<8x192xf32> to vector<8x64xf32>
    %94 = vector.extract_strided_slice %89 {offsets = [0, 128], sizes = [8, 64], strides = [1, 1]} : vector<8x192xf32> to vector<8x64xf32>
    %95 = arith.mulf %93, %53 : vector<8x64xf32>
    %96 = arith.mulf %92, %91 : vector<8x64xf32>
    %97 = arith.addf %95, %96 : vector<8x64xf32>
    %98 = math.tanh %97 : vector<8x64xf32>
    %99 = arith.mulf %94, %98 : vector<8x64xf32>
    %c0_45 = arith.constant 0 : index
    %c2 = arith.constant 2 : index
    %c0_46 = arith.constant 0 : index
    %100 = vector.load %arg1[%c0_45, %c2, %c0_46] : memref<8x8x10xf32, #tpu.memory_space<vmem>>, vector<8x1x10xf32>
    %101 = vector.shape_cast %100 : vector<8x1x10xf32> to vector<8x10xf32>
    %c0_47 = arith.constant 0 : index
    %c0_48 = arith.constant 0 : index
    %102 = vector.load %arg9[%c0_47, %c0_48] : memref<8x74xf32, #tpu.memory_space<vmem>>, vector<8x10xf32>
    tpu.vector_store %arg9[%c0_47, %c0_48], %101 {strides = array<i32>} : memref<8x74xf32, #tpu.memory_space<vmem>>, vector<8x10xf32>,
    %c0_49 = arith.constant 0 : index
    %c10_50 = arith.constant 10 : index
    %103 = vector.load %arg9[%c0_49, %c10_50] : memref<8x74xf32, #tpu.memory_space<vmem>>, vector<8x64xf32>
    tpu.vector_store %arg9[%c0_49, %c10_50], %78 {strides = array<i32>} : memref<8x74xf32, #tpu.memory_space<vmem>>, vector<8x64xf32>,
    %c0_51 = arith.constant 0 : index
    %c0_52 = arith.constant 0 : index
    %104 = vector.load %arg9[%c0_51, %c0_52] : memref<8x74xf32, #tpu.memory_space<vmem>>, vector<8x74xf32>
    %cst_53 = arith.constant dense<0.000000e+00> : vector<8x256xf32>
    %105 = tpu.matmul %104, %0, %cst_53 {dimension_numbers = #tpu.dot_dimension_numbers<[1], [0], [0], [1], [0, 0, 1, 1], [], []>} : vector<8x74xf32>, vector<74x256xf32>, vector<8x256xf32> -> vector<8x256xf32>
    %106 = arith.addf %105, %4 : vector<8x256xf32>
    %107 = vector.extract_strided_slice %106 {offsets = [0, 0], sizes = [8, 192], strides = [1, 1]} : vector<8x256xf32> to vector<8x192xf32>
    %108 = arith.negf %107 : vector<8x192xf32>
    %109 = math.exp %108 : vector<8x192xf32>
    %cst_54 = arith.constant 1.000000e+00 : f32
    %110 = vector.broadcast %cst_54 : f32 to vector<8x192xf32>
    %111 = arith.addf %110, %109 : vector<8x192xf32>
    %112 = arith.divf %110, %111 : vector<8x192xf32>
    %113 = vector.extract_strided_slice %106 {offsets = [0, 192], sizes = [8, 64], strides = [1, 1]} : vector<8x256xf32> to vector<8x64xf32>
    %114 = math.tanh %113 : vector<8x64xf32>
    %115 = vector.extract_strided_slice %112 {offsets = [0, 0], sizes = [8, 64], strides = [1, 1]} : vector<8x192xf32> to vector<8x64xf32>
    %116 = vector.extract_strided_slice %112 {offsets = [0, 64], sizes = [8, 64], strides = [1, 1]} : vector<8x192xf32> to vector<8x64xf32>
    %117 = vector.extract_strided_slice %112 {offsets = [0, 128], sizes = [8, 64], strides = [1, 1]} : vector<8x192xf32> to vector<8x64xf32>
    %118 = arith.mulf %116, %76 : vector<8x64xf32>
    %119 = arith.mulf %115, %114 : vector<8x64xf32>
    %120 = arith.addf %118, %119 : vector<8x64xf32>
    %121 = math.tanh %120 : vector<8x64xf32>
    %122 = arith.mulf %117, %121 : vector<8x64xf32>
    %c0_55 = arith.constant 0 : index
    %c0_56 = arith.constant 0 : index
    %123 = vector.load %arg10[%c0_55, %c0_56] : memref<8x128xf32, #tpu.memory_space<vmem>>, vector<8x64xf32>
    tpu.vector_store %arg10[%c0_55, %c0_56], %122 {strides = array<i32>} : memref<8x128xf32, #tpu.memory_space<vmem>>, vector<8x64xf32>,
    %c0_57 = arith.constant 0 : index
    %c64_58 = arith.constant 64 : index
    %124 = vector.load %arg10[%c0_57, %c64_58] : memref<8x128xf32, #tpu.memory_space<vmem>>, vector<8x64xf32>
    tpu.vector_store %arg10[%c0_57, %c64_58], %99 {strides = array<i32>} : memref<8x128xf32, #tpu.memory_space<vmem>>, vector<8x64xf32>,
    %c0_59 = arith.constant 0 : index
    %c0_60 = arith.constant 0 : index
    %125 = vector.load %arg10[%c0_59, %c0_60] : memref<8x128xf32, #tpu.memory_space<vmem>>, vector<8x128xf32>
    %cst_61 = arith.constant dense<0.000000e+00> : vector<8x256xf32>
    %126 = tpu.matmul %125, %1, %cst_61 {dimension_numbers = #tpu.dot_dimension_numbers<[1], [0], [0], [1], [0, 0, 1, 1], [], []>} : vector<8x128xf32>, vector<128x256xf32>, vector<8x256xf32> -> vector<8x256xf32>
    %127 = arith.addf %126, %7 : vector<8x256xf32>
    %128 = vector.extract_strided_slice %127 {offsets = [0, 0], sizes = [8, 192], strides = [1, 1]} : vector<8x256xf32> to vector<8x192xf32>
    %129 = arith.negf %128 : vector<8x192xf32>
    %130 = math.exp %129 : vector<8x192xf32>
    %cst_62 = arith.constant 1.000000e+00 : f32
    %131 = vector.broadcast %cst_62 : f32 to vector<8x192xf32>
    %132 = arith.addf %131, %130 : vector<8x192xf32>
    %133 = arith.divf %131, %132 : vector<8x192xf32>
    %134 = vector.extract_strided_slice %127 {offsets = [0, 192], sizes = [8, 64], strides = [1, 1]} : vector<8x256xf32> to vector<8x64xf32>
    %135 = math.tanh %134 : vector<8x64xf32>
    %136 = vector.extract_strided_slice %133 {offsets = [0, 0], sizes = [8, 64], strides = [1, 1]} : vector<8x192xf32> to vector<8x64xf32>
    %137 = vector.extract_strided_slice %133 {offsets = [0, 64], sizes = [8, 64], strides = [1, 1]} : vector<8x192xf32> to vector<8x64xf32>
    %138 = vector.extract_strided_slice %133 {offsets = [0, 128], sizes = [8, 64], strides = [1, 1]} : vector<8x192xf32> to vector<8x64xf32>
    %139 = arith.mulf %137, %97 : vector<8x64xf32>
    %140 = arith.mulf %136, %135 : vector<8x64xf32>
    %141 = arith.addf %139, %140 : vector<8x64xf32>
    %142 = math.tanh %141 : vector<8x64xf32>
    %143 = arith.mulf %138, %142 : vector<8x64xf32>
    %c0_63 = arith.constant 0 : index
    %c3 = arith.constant 3 : index
    %c0_64 = arith.constant 0 : index
    %144 = vector.load %arg1[%c0_63, %c3, %c0_64] : memref<8x8x10xf32, #tpu.memory_space<vmem>>, vector<8x1x10xf32>
    %145 = vector.shape_cast %144 : vector<8x1x10xf32> to vector<8x10xf32>
    %c0_65 = arith.constant 0 : index
    %c0_66 = arith.constant 0 : index
    %146 = vector.load %arg9[%c0_65, %c0_66] : memref<8x74xf32, #tpu.memory_space<vmem>>, vector<8x10xf32>
    tpu.vector_store %arg9[%c0_65, %c0_66], %145 {strides = array<i32>} : memref<8x74xf32, #tpu.memory_space<vmem>>, vector<8x10xf32>,
    %c0_67 = arith.constant 0 : index
    %c10_68 = arith.constant 10 : index
    %147 = vector.load %arg9[%c0_67, %c10_68] : memref<8x74xf32, #tpu.memory_space<vmem>>, vector<8x64xf32>
    tpu.vector_store %arg9[%c0_67, %c10_68], %122 {strides = array<i32>} : memref<8x74xf32, #tpu.memory_space<vmem>>, vector<8x64xf32>,
    %c0_69 = arith.constant 0 : index
    %c0_70 = arith.constant 0 : index
    %148 = vector.load %arg9[%c0_69, %c0_70] : memref<8x74xf32, #tpu.memory_space<vmem>>, vector<8x74xf32>
    %cst_71 = arith.constant dense<0.000000e+00> : vector<8x256xf32>
    %149 = tpu.matmul %148, %0, %cst_71 {dimension_numbers = #tpu.dot_dimension_numbers<[1], [0], [0], [1], [0, 0, 1, 1], [], []>} : vector<8x74xf32>, vector<74x256xf32>, vector<8x256xf32> -> vector<8x256xf32>
    %150 = arith.addf %149, %4 : vector<8x256xf32>
    %151 = vector.extract_strided_slice %150 {offsets = [0, 0], sizes = [8, 192], strides = [1, 1]} : vector<8x256xf32> to vector<8x192xf32>
    %152 = arith.negf %151 : vector<8x192xf32>
    %153 = math.exp %152 : vector<8x192xf32>
    %cst_72 = arith.constant 1.000000e+00 : f32
    %154 = vector.broadcast %cst_72 : f32 to vector<8x192xf32>
    %155 = arith.addf %154, %153 : vector<8x192xf32>
    %156 = arith.divf %154, %155 : vector<8x192xf32>
    %157 = vector.extract_strided_slice %150 {offsets = [0, 192], sizes = [8, 64], strides = [1, 1]} : vector<8x256xf32> to vector<8x64xf32>
    %158 = math.tanh %157 : vector<8x64xf32>
    %159 = vector.extract_strided_slice %156 {offsets = [0, 0], sizes = [8, 64], strides = [1, 1]} : vector<8x192xf32> to vector<8x64xf32>
    %160 = vector.extract_strided_slice %156 {offsets = [0, 64], sizes = [8, 64], strides = [1, 1]} : vector<8x192xf32> to vector<8x64xf32>
    %161 = vector.extract_strided_slice %156 {offsets = [0, 128], sizes = [8, 64], strides = [1, 1]} : vector<8x192xf32> to vector<8x64xf32>
    %162 = arith.mulf %160, %120 : vector<8x64xf32>
    %163 = arith.mulf %159, %158 : vector<8x64xf32>
    %164 = arith.addf %162, %163 : vector<8x64xf32>
    %165 = math.tanh %164 : vector<8x64xf32>
    %166 = arith.mulf %161, %165 : vector<8x64xf32>
    %c0_73 = arith.constant 0 : index
    %c0_74 = arith.constant 0 : index
    %167 = vector.load %arg10[%c0_73, %c0_74] : memref<8x128xf32, #tpu.memory_space<vmem>>, vector<8x64xf32>
    tpu.vector_store %arg10[%c0_73, %c0_74], %166 {strides = array<i32>} : memref<8x128xf32, #tpu.memory_space<vmem>>, vector<8x64xf32>,
    %c0_75 = arith.constant 0 : index
    %c64_76 = arith.constant 64 : index
    %168 = vector.load %arg10[%c0_75, %c64_76] : memref<8x128xf32, #tpu.memory_space<vmem>>, vector<8x64xf32>
    tpu.vector_store %arg10[%c0_75, %c64_76], %143 {strides = array<i32>} : memref<8x128xf32, #tpu.memory_space<vmem>>, vector<8x64xf32>,
    %c0_77 = arith.constant 0 : index
    %c0_78 = arith.constant 0 : index
    %169 = vector.load %arg10[%c0_77, %c0_78] : memref<8x128xf32, #tpu.memory_space<vmem>>, vector<8x128xf32>
    %cst_79 = arith.constant dense<0.000000e+00> : vector<8x256xf32>
    %170 = tpu.matmul %169, %1, %cst_79 {dimension_numbers = #tpu.dot_dimension_numbers<[1], [0], [0], [1], [0, 0, 1, 1], [], []>} : vector<8x128xf32>, vector<128x256xf32>, vector<8x256xf32> -> vector<8x256xf32>
    %171 = arith.addf %170, %7 : vector<8x256xf32>
    %172 = vector.extract_strided_slice %171 {offsets = [0, 0], sizes = [8, 192], strides = [1, 1]} : vector<8x256xf32> to vector<8x192xf32>
    %173 = arith.negf %172 : vector<8x192xf32>
    %174 = math.exp %173 : vector<8x192xf32>
    %cst_80 = arith.constant 1.000000e+00 : f32
    %175 = vector.broadcast %cst_80 : f32 to vector<8x192xf32>
    %176 = arith.addf %175, %174 : vector<8x192xf32>
    %177 = arith.divf %175, %176 : vector<8x192xf32>
    %178 = vector.extract_strided_slice %171 {offsets = [0, 192], sizes = [8, 64], strides = [1, 1]} : vector<8x256xf32> to vector<8x64xf32>
    %179 = math.tanh %178 : vector<8x64xf32>
    %180 = vector.extract_strided_slice %177 {offsets = [0, 0], sizes = [8, 64], strides = [1, 1]} : vector<8x192xf32> to vector<8x64xf32>
    %181 = vector.extract_strided_slice %177 {offsets = [0, 64], sizes = [8, 64], strides = [1, 1]} : vector<8x192xf32> to vector<8x64xf32>
    %182 = vector.extract_strided_slice %177 {offsets = [0, 128], sizes = [8, 64], strides = [1, 1]} : vector<8x192xf32> to vector<8x64xf32>
    %183 = arith.mulf %181, %141 : vector<8x64xf32>
    %184 = arith.mulf %180, %179 : vector<8x64xf32>
    %185 = arith.addf %183, %184 : vector<8x64xf32>
    %186 = math.tanh %185 : vector<8x64xf32>
    %187 = arith.mulf %182, %186 : vector<8x64xf32>
    %c0_81 = arith.constant 0 : index
    %c4 = arith.constant 4 : index
    %c0_82 = arith.constant 0 : index
    %188 = vector.load %arg1[%c0_81, %c4, %c0_82] : memref<8x8x10xf32, #tpu.memory_space<vmem>>, vector<8x1x10xf32>
    %189 = vector.shape_cast %188 : vector<8x1x10xf32> to vector<8x10xf32>
    %c0_83 = arith.constant 0 : index
    %c0_84 = arith.constant 0 : index
    %190 = vector.load %arg9[%c0_83, %c0_84] : memref<8x74xf32, #tpu.memory_space<vmem>>, vector<8x10xf32>
    tpu.vector_store %arg9[%c0_83, %c0_84], %189 {strides = array<i32>} : memref<8x74xf32, #tpu.memory_space<vmem>>, vector<8x10xf32>,
    %c0_85 = arith.constant 0 : index
    %c10_86 = arith.constant 10 : index
    %191 = vector.load %arg9[%c0_85, %c10_86] : memref<8x74xf32, #tpu.memory_space<vmem>>, vector<8x64xf32>
    tpu.vector_store %arg9[%c0_85, %c10_86], %166 {strides = array<i32>} : memref<8x74xf32, #tpu.memory_space<vmem>>, vector<8x64xf32>,
    %c0_87 = arith.constant 0 : index
    %c0_88 = arith.constant 0 : index
    %192 = vector.load %arg9[%c0_87, %c0_88] : memref<8x74xf32, #tpu.memory_space<vmem>>, vector<8x74xf32>
    %cst_89 = arith.constant dense<0.000000e+00> : vector<8x256xf32>
    %193 = tpu.matmul %192, %0, %cst_89 {dimension_numbers = #tpu.dot_dimension_numbers<[1], [0], [0], [1], [0, 0, 1, 1], [], []>} : vector<8x74xf32>, vector<74x256xf32>, vector<8x256xf32> -> vector<8x256xf32>
    %194 = arith.addf %193, %4 : vector<8x256xf32>
    %195 = vector.extract_strided_slice %194 {offsets = [0, 0], sizes = [8, 192], strides = [1, 1]} : vector<8x256xf32> to vector<8x192xf32>
    %196 = arith.negf %195 : vector<8x192xf32>
    %197 = math.exp %196 : vector<8x192xf32>
    %cst_90 = arith.constant 1.000000e+00 : f32
    %198 = vector.broadcast %cst_90 : f32 to vector<8x192xf32>
    %199 = arith.addf %198, %197 : vector<8x192xf32>
    %200 = arith.divf %198, %199 : vector<8x192xf32>
    %201 = vector.extract_strided_slice %194 {offsets = [0, 192], sizes = [8, 64], strides = [1, 1]} : vector<8x256xf32> to vector<8x64xf32>
    %202 = math.tanh %201 : vector<8x64xf32>
    %203 = vector.extract_strided_slice %200 {offsets = [0, 0], sizes = [8, 64], strides = [1, 1]} : vector<8x192xf32> to vector<8x64xf32>
    %204 = vector.extract_strided_slice %200 {offsets = [0, 64], sizes = [8, 64], strides = [1, 1]} : vector<8x192xf32> to vector<8x64xf32>
    %205 = vector.extract_strided_slice %200 {offsets = [0, 128], sizes = [8, 64], strides = [1, 1]} : vector<8x192xf32> to vector<8x64xf32>
    %206 = arith.mulf %204, %164 : vector<8x64xf32>
    %207 = arith.mulf %203, %202 : vector<8x64xf32>
    %208 = arith.addf %206, %207 : vector<8x64xf32>
    %209 = math.tanh %208 : vector<8x64xf32>
    %210 = arith.mulf %205, %209 : vector<8x64xf32>
    %c0_91 = arith.constant 0 : index
    %c0_92 = arith.constant 0 : index
    %211 = vector.load %arg10[%c0_91, %c0_92] : memref<8x128xf32, #tpu.memory_space<vmem>>, vector<8x64xf32>
    tpu.vector_store %arg10[%c0_91, %c0_92], %210 {strides = array<i32>} : memref<8x128xf32, #tpu.memory_space<vmem>>, vector<8x64xf32>,
    %c0_93 = arith.constant 0 : index
    %c64_94 = arith.constant 64 : index
    %212 = vector.load %arg10[%c0_93, %c64_94] : memref<8x128xf32, #tpu.memory_space<vmem>>, vector<8x64xf32>
    tpu.vector_store %arg10[%c0_93, %c64_94], %187 {strides = array<i32>} : memref<8x128xf32, #tpu.memory_space<vmem>>, vector<8x64xf32>,
    %c0_95 = arith.constant 0 : index
    %c0_96 = arith.constant 0 : index
    %213 = vector.load %arg10[%c0_95, %c0_96] : memref<8x128xf32, #tpu.memory_space<vmem>>, vector<8x128xf32>
    %cst_97 = arith.constant dense<0.000000e+00> : vector<8x256xf32>
    %214 = tpu.matmul %213, %1, %cst_97 {dimension_numbers = #tpu.dot_dimension_numbers<[1], [0], [0], [1], [0, 0, 1, 1], [], []>} : vector<8x128xf32>, vector<128x256xf32>, vector<8x256xf32> -> vector<8x256xf32>
    %215 = arith.addf %214, %7 : vector<8x256xf32>
    %216 = vector.extract_strided_slice %215 {offsets = [0, 0], sizes = [8, 192], strides = [1, 1]} : vector<8x256xf32> to vector<8x192xf32>
    %217 = arith.negf %216 : vector<8x192xf32>
    %218 = math.exp %217 : vector<8x192xf32>
    %cst_98 = arith.constant 1.000000e+00 : f32
    %219 = vector.broadcast %cst_98 : f32 to vector<8x192xf32>
    %220 = arith.addf %219, %218 : vector<8x192xf32>
    %221 = arith.divf %219, %220 : vector<8x192xf32>
    %222 = vector.extract_strided_slice %215 {offsets = [0, 192], sizes = [8, 64], strides = [1, 1]} : vector<8x256xf32> to vector<8x64xf32>
    %223 = math.tanh %222 : vector<8x64xf32>
    %224 = vector.extract_strided_slice %221 {offsets = [0, 0], sizes = [8, 64], strides = [1, 1]} : vector<8x192xf32> to vector<8x64xf32>
    %225 = vector.extract_strided_slice %221 {offsets = [0, 64], sizes = [8, 64], strides = [1, 1]} : vector<8x192xf32> to vector<8x64xf32>
    %226 = vector.extract_strided_slice %221 {offsets = [0, 128], sizes = [8, 64], strides = [1, 1]} : vector<8x192xf32> to vector<8x64xf32>
    %227 = arith.mulf %225, %185 : vector<8x64xf32>
    %228 = arith.mulf %224, %223 : vector<8x64xf32>
    %229 = arith.addf %227, %228 : vector<8x64xf32>
    %230 = math.tanh %229 : vector<8x64xf32>
    %231 = arith.mulf %226, %230 : vector<8x64xf32>
    %c0_99 = arith.constant 0 : index
    %c5 = arith.constant 5 : index
    %c0_100 = arith.constant 0 : index
    %232 = vector.load %arg1[%c0_99, %c5, %c0_100] : memref<8x8x10xf32, #tpu.memory_space<vmem>>, vector<8x1x10xf32>
    %233 = vector.shape_cast %232 : vector<8x1x10xf32> to vector<8x10xf32>
    %c0_101 = arith.constant 0 : index
    %c0_102 = arith.constant 0 : index
    %234 = vector.load %arg9[%c0_101, %c0_102] : memref<8x74xf32, #tpu.memory_space<vmem>>, vector<8x10xf32>
    tpu.vector_store %arg9[%c0_101, %c0_102], %233 {strides = array<i32>} : memref<8x74xf32, #tpu.memory_space<vmem>>, vector<8x10xf32>,
    %c0_103 = arith.constant 0 : index
    %c10_104 = arith.constant 10 : index
    %235 = vector.load %arg9[%c0_103, %c10_104] : memref<8x74xf32, #tpu.memory_space<vmem>>, vector<8x64xf32>
    tpu.vector_store %arg9[%c0_103, %c10_104], %210 {strides = array<i32>} : memref<8x74xf32, #tpu.memory_space<vmem>>, vector<8x64xf32>,
    %c0_105 = arith.constant 0 : index
    %c0_106 = arith.constant 0 : index
    %236 = vector.load %arg9[%c0_105, %c0_106] : memref<8x74xf32, #tpu.memory_space<vmem>>, vector<8x74xf32>
    %cst_107 = arith.constant dense<0.000000e+00> : vector<8x256xf32>
    %237 = tpu.matmul %236, %0, %cst_107 {dimension_numbers = #tpu.dot_dimension_numbers<[1], [0], [0], [1], [0, 0, 1, 1], [], []>} : vector<8x74xf32>, vector<74x256xf32>, vector<8x256xf32> -> vector<8x256xf32>
    %238 = arith.addf %237, %4 : vector<8x256xf32>
    %239 = vector.extract_strided_slice %238 {offsets = [0, 0], sizes = [8, 192], strides = [1, 1]} : vector<8x256xf32> to vector<8x192xf32>
    %240 = arith.negf %239 : vector<8x192xf32>
    %241 = math.exp %240 : vector<8x192xf32>
    %cst_108 = arith.constant 1.000000e+00 : f32
    %242 = vector.broadcast %cst_108 : f32 to vector<8x192xf32>
    %243 = arith.addf %242, %241 : vector<8x192xf32>
    %244 = arith.divf %242, %243 : vector<8x192xf32>
    %245 = vector.extract_strided_slice %238 {offsets = [0, 192], sizes = [8, 64], strides = [1, 1]} : vector<8x256xf32> to vector<8x64xf32>
    %246 = math.tanh %245 : vector<8x64xf32>
    %247 = vector.extract_strided_slice %244 {offsets = [0, 0], sizes = [8, 64], strides = [1, 1]} : vector<8x192xf32> to vector<8x64xf32>
    %248 = vector.extract_strided_slice %244 {offsets = [0, 64], sizes = [8, 64], strides = [1, 1]} : vector<8x192xf32> to vector<8x64xf32>
    %249 = vector.extract_strided_slice %244 {offsets = [0, 128], sizes = [8, 64], strides = [1, 1]} : vector<8x192xf32> to vector<8x64xf32>
    %250 = arith.mulf %248, %208 : vector<8x64xf32>
    %251 = arith.mulf %247, %246 : vector<8x64xf32>
    %252 = arith.addf %250, %251 : vector<8x64xf32>
    %253 = math.tanh %252 : vector<8x64xf32>
    %254 = arith.mulf %249, %253 : vector<8x64xf32>
    %c0_109 = arith.constant 0 : index
    %c0_110 = arith.constant 0 : index
    %255 = vector.load %arg10[%c0_109, %c0_110] : memref<8x128xf32, #tpu.memory_space<vmem>>, vector<8x64xf32>
    tpu.vector_store %arg10[%c0_109, %c0_110], %254 {strides = array<i32>} : memref<8x128xf32, #tpu.memory_space<vmem>>, vector<8x64xf32>,
    %c0_111 = arith.constant 0 : index
    %c64_112 = arith.constant 64 : index
    %256 = vector.load %arg10[%c0_111, %c64_112] : memref<8x128xf32, #tpu.memory_space<vmem>>, vector<8x64xf32>
    tpu.vector_store %arg10[%c0_111, %c64_112], %231 {strides = array<i32>} : memref<8x128xf32, #tpu.memory_space<vmem>>, vector<8x64xf32>,
    %c0_113 = arith.constant 0 : index
    %c0_114 = arith.constant 0 : index
    %257 = vector.load %arg10[%c0_113, %c0_114] : memref<8x128xf32, #tpu.memory_space<vmem>>, vector<8x128xf32>
    %cst_115 = arith.constant dense<0.000000e+00> : vector<8x256xf32>
    %258 = tpu.matmul %257, %1, %cst_115 {dimension_numbers = #tpu.dot_dimension_numbers<[1], [0], [0], [1], [0, 0, 1, 1], [], []>} : vector<8x128xf32>, vector<128x256xf32>, vector<8x256xf32> -> vector<8x256xf32>
    %259 = arith.addf %258, %7 : vector<8x256xf32>
    %260 = vector.extract_strided_slice %259 {offsets = [0, 0], sizes = [8, 192], strides = [1, 1]} : vector<8x256xf32> to vector<8x192xf32>
    %261 = arith.negf %260 : vector<8x192xf32>
    %262 = math.exp %261 : vector<8x192xf32>
    %cst_116 = arith.constant 1.000000e+00 : f32
    %263 = vector.broadcast %cst_116 : f32 to vector<8x192xf32>
    %264 = arith.addf %263, %262 : vector<8x192xf32>
    %265 = arith.divf %263, %264 : vector<8x192xf32>
    %266 = vector.extract_strided_slice %259 {offsets = [0, 192], sizes = [8, 64], strides = [1, 1]} : vector<8x256xf32> to vector<8x64xf32>
    %267 = math.tanh %266 : vector<8x64xf32>
    %268 = vector.extract_strided_slice %265 {offsets = [0, 0], sizes = [8, 64], strides = [1, 1]} : vector<8x192xf32> to vector<8x64xf32>
    %269 = vector.extract_strided_slice %265 {offsets = [0, 64], sizes = [8, 64], strides = [1, 1]} : vector<8x192xf32> to vector<8x64xf32>
    %270 = vector.extract_strided_slice %265 {offsets = [0, 128], sizes = [8, 64], strides = [1, 1]} : vector<8x192xf32> to vector<8x64xf32>
    %271 = arith.mulf %269, %229 : vector<8x64xf32>
    %272 = arith.mulf %268, %267 : vector<8x64xf32>
    %273 = arith.addf %271, %272 : vector<8x64xf32>
    %274 = math.tanh %273 : vector<8x64xf32>
    %275 = arith.mulf %270, %274 : vector<8x64xf32>
    %c0_117 = arith.constant 0 : index
    %c6 = arith.constant 6 : index
    %c0_118 = arith.constant 0 : index
    %276 = vector.load %arg1[%c0_117, %c6, %c0_118] : memref<8x8x10xf32, #tpu.memory_space<vmem>>, vector<8x1x10xf32>
    %277 = vector.shape_cast %276 : vector<8x1x10xf32> to vector<8x10xf32>
    %c0_119 = arith.constant 0 : index
    %c0_120 = arith.constant 0 : index
    %278 = vector.load %arg9[%c0_119, %c0_120] : memref<8x74xf32, #tpu.memory_space<vmem>>, vector<8x10xf32>
    tpu.vector_store %arg9[%c0_119, %c0_120], %277 {strides = array<i32>} : memref<8x74xf32, #tpu.memory_space<vmem>>, vector<8x10xf32>,
    %c0_121 = arith.constant 0 : index
    %c10_122 = arith.constant 10 : index
    %279 = vector.load %arg9[%c0_121, %c10_122] : memref<8x74xf32, #tpu.memory_space<vmem>>, vector<8x64xf32>
    tpu.vector_store %arg9[%c0_121, %c10_122], %254 {strides = array<i32>} : memref<8x74xf32, #tpu.memory_space<vmem>>, vector<8x64xf32>,
    %c0_123 = arith.constant 0 : index
    %c0_124 = arith.constant 0 : index
    %280 = vector.load %arg9[%c0_123, %c0_124] : memref<8x74xf32, #tpu.memory_space<vmem>>, vector<8x74xf32>
    %cst_125 = arith.constant dense<0.000000e+00> : vector<8x256xf32>
    %281 = tpu.matmul %280, %0, %cst_125 {dimension_numbers = #tpu.dot_dimension_numbers<[1], [0], [0], [1], [0, 0, 1, 1], [], []>} : vector<8x74xf32>, vector<74x256xf32>, vector<8x256xf32> -> vector<8x256xf32>
    %282 = arith.addf %281, %4 : vector<8x256xf32>
    %283 = vector.extract_strided_slice %282 {offsets = [0, 0], sizes = [8, 192], strides = [1, 1]} : vector<8x256xf32> to vector<8x192xf32>
    %284 = arith.negf %283 : vector<8x192xf32>
    %285 = math.exp %284 : vector<8x192xf32>
    %cst_126 = arith.constant 1.000000e+00 : f32
    %286 = vector.broadcast %cst_126 : f32 to vector<8x192xf32>
    %287 = arith.addf %286, %285 : vector<8x192xf32>
    %288 = arith.divf %286, %287 : vector<8x192xf32>
    %289 = vector.extract_strided_slice %282 {offsets = [0, 192], sizes = [8, 64], strides = [1, 1]} : vector<8x256xf32> to vector<8x64xf32>
    %290 = math.tanh %289 : vector<8x64xf32>
    %291 = vector.extract_strided_slice %288 {offsets = [0, 0], sizes = [8, 64], strides = [1, 1]} : vector<8x192xf32> to vector<8x64xf32>
    %292 = vector.extract_strided_slice %288 {offsets = [0, 64], sizes = [8, 64], strides = [1, 1]} : vector<8x192xf32> to vector<8x64xf32>
    %293 = vector.extract_strided_slice %288 {offsets = [0, 128], sizes = [8, 64], strides = [1, 1]} : vector<8x192xf32> to vector<8x64xf32>
    %294 = arith.mulf %292, %252 : vector<8x64xf32>
    %295 = arith.mulf %291, %290 : vector<8x64xf32>
    %296 = arith.addf %294, %295 : vector<8x64xf32>
    %297 = math.tanh %296 : vector<8x64xf32>
    %298 = arith.mulf %293, %297 : vector<8x64xf32>
    %c0_127 = arith.constant 0 : index
    %c0_128 = arith.constant 0 : index
    %299 = vector.load %arg10[%c0_127, %c0_128] : memref<8x128xf32, #tpu.memory_space<vmem>>, vector<8x64xf32>
    tpu.vector_store %arg10[%c0_127, %c0_128], %298 {strides = array<i32>} : memref<8x128xf32, #tpu.memory_space<vmem>>, vector<8x64xf32>,
    %c0_129 = arith.constant 0 : index
    %c64_130 = arith.constant 64 : index
    %300 = vector.load %arg10[%c0_129, %c64_130] : memref<8x128xf32, #tpu.memory_space<vmem>>, vector<8x64xf32>
    tpu.vector_store %arg10[%c0_129, %c64_130], %275 {strides = array<i32>} : memref<8x128xf32, #tpu.memory_space<vmem>>, vector<8x64xf32>,
    %c0_131 = arith.constant 0 : index
    %c0_132 = arith.constant 0 : index
    %301 = vector.load %arg10[%c0_131, %c0_132] : memref<8x128xf32, #tpu.memory_space<vmem>>, vector<8x128xf32>
    %cst_133 = arith.constant dense<0.000000e+00> : vector<8x256xf32>
    %302 = tpu.matmul %301, %1, %cst_133 {dimension_numbers = #tpu.dot_dimension_numbers<[1], [0], [0], [1], [0, 0, 1, 1], [], []>} : vector<8x128xf32>, vector<128x256xf32>, vector<8x256xf32> -> vector<8x256xf32>
    %303 = arith.addf %302, %7 : vector<8x256xf32>
    %304 = vector.extract_strided_slice %303 {offsets = [0, 0], sizes = [8, 192], strides = [1, 1]} : vector<8x256xf32> to vector<8x192xf32>
    %305 = arith.negf %304 : vector<8x192xf32>
    %306 = math.exp %305 : vector<8x192xf32>
    %cst_134 = arith.constant 1.000000e+00 : f32
    %307 = vector.broadcast %cst_134 : f32 to vector<8x192xf32>
    %308 = arith.addf %307, %306 : vector<8x192xf32>
    %309 = arith.divf %307, %308 : vector<8x192xf32>
    %310 = vector.extract_strided_slice %303 {offsets = [0, 192], sizes = [8, 64], strides = [1, 1]} : vector<8x256xf32> to vector<8x64xf32>
    %311 = math.tanh %310 : vector<8x64xf32>
    %312 = vector.extract_strided_slice %309 {offsets = [0, 0], sizes = [8, 64], strides = [1, 1]} : vector<8x192xf32> to vector<8x64xf32>
    %313 = vector.extract_strided_slice %309 {offsets = [0, 64], sizes = [8, 64], strides = [1, 1]} : vector<8x192xf32> to vector<8x64xf32>
    %314 = vector.extract_strided_slice %309 {offsets = [0, 128], sizes = [8, 64], strides = [1, 1]} : vector<8x192xf32> to vector<8x64xf32>
    %315 = arith.mulf %313, %273 : vector<8x64xf32>
    %316 = arith.mulf %312, %311 : vector<8x64xf32>
    %317 = arith.addf %315, %316 : vector<8x64xf32>
    %318 = math.tanh %317 : vector<8x64xf32>
    %319 = arith.mulf %314, %318 : vector<8x64xf32>
    %c0_135 = arith.constant 0 : index
    %c7 = arith.constant 7 : index
    %c0_136 = arith.constant 0 : index
    %320 = vector.load %arg1[%c0_135, %c7, %c0_136] : memref<8x8x10xf32, #tpu.memory_space<vmem>>, vector<8x1x10xf32>
    %321 = vector.shape_cast %320 : vector<8x1x10xf32> to vector<8x10xf32>
    %c0_137 = arith.constant 0 : index
    %c0_138 = arith.constant 0 : index
    %322 = vector.load %arg9[%c0_137, %c0_138] : memref<8x74xf32, #tpu.memory_space<vmem>>, vector<8x10xf32>
    tpu.vector_store %arg9[%c0_137, %c0_138], %321 {strides = array<i32>} : memref<8x74xf32, #tpu.memory_space<vmem>>, vector<8x10xf32>,
    %c0_139 = arith.constant 0 : index
    %c10_140 = arith.constant 10 : index
    %323 = vector.load %arg9[%c0_139, %c10_140] : memref<8x74xf32, #tpu.memory_space<vmem>>, vector<8x64xf32>
    tpu.vector_store %arg9[%c0_139, %c10_140], %298 {strides = array<i32>} : memref<8x74xf32, #tpu.memory_space<vmem>>, vector<8x64xf32>,
    %c0_141 = arith.constant 0 : index
    %c0_142 = arith.constant 0 : index
    %324 = vector.load %arg9[%c0_141, %c0_142] : memref<8x74xf32, #tpu.memory_space<vmem>>, vector<8x74xf32>
    %cst_143 = arith.constant dense<0.000000e+00> : vector<8x256xf32>
    %325 = tpu.matmul %324, %0, %cst_143 {dimension_numbers = #tpu.dot_dimension_numbers<[1], [0], [0], [1], [0, 0, 1, 1], [], []>} : vector<8x74xf32>, vector<74x256xf32>, vector<8x256xf32> -> vector<8x256xf32>
    %326 = arith.addf %325, %4 : vector<8x256xf32>
    %327 = vector.extract_strided_slice %326 {offsets = [0, 0], sizes = [8, 192], strides = [1, 1]} : vector<8x256xf32> to vector<8x192xf32>
    %328 = arith.negf %327 : vector<8x192xf32>
    %329 = math.exp %328 : vector<8x192xf32>
    %cst_144 = arith.constant 1.000000e+00 : f32
    %330 = vector.broadcast %cst_144 : f32 to vector<8x192xf32>
    %331 = arith.addf %330, %329 : vector<8x192xf32>
    %332 = arith.divf %330, %331 : vector<8x192xf32>
    %333 = vector.extract_strided_slice %326 {offsets = [0, 192], sizes = [8, 64], strides = [1, 1]} : vector<8x256xf32> to vector<8x64xf32>
    %334 = math.tanh %333 : vector<8x64xf32>
    %335 = vector.extract_strided_slice %332 {offsets = [0, 0], sizes = [8, 64], strides = [1, 1]} : vector<8x192xf32> to vector<8x64xf32>
    %336 = vector.extract_strided_slice %332 {offsets = [0, 64], sizes = [8, 64], strides = [1, 1]} : vector<8x192xf32> to vector<8x64xf32>
    %337 = vector.extract_strided_slice %332 {offsets = [0, 128], sizes = [8, 64], strides = [1, 1]} : vector<8x192xf32> to vector<8x64xf32>
    %338 = arith.mulf %336, %296 : vector<8x64xf32>
    %339 = arith.mulf %335, %334 : vector<8x64xf32>
    %340 = arith.addf %338, %339 : vector<8x64xf32>
    %341 = math.tanh %340 : vector<8x64xf32>
    %342 = arith.mulf %337, %341 : vector<8x64xf32>
    %c0_145 = arith.constant 0 : index
    %c0_146 = arith.constant 0 : index
    %343 = vector.load %arg10[%c0_145, %c0_146] : memref<8x128xf32, #tpu.memory_space<vmem>>, vector<8x64xf32>
    tpu.vector_store %arg10[%c0_145, %c0_146], %342 {strides = array<i32>} : memref<8x128xf32, #tpu.memory_space<vmem>>, vector<8x64xf32>,
    %c0_147 = arith.constant 0 : index
    %c64_148 = arith.constant 64 : index
    %344 = vector.load %arg10[%c0_147, %c64_148] : memref<8x128xf32, #tpu.memory_space<vmem>>, vector<8x64xf32>
    tpu.vector_store %arg10[%c0_147, %c64_148], %319 {strides = array<i32>} : memref<8x128xf32, #tpu.memory_space<vmem>>, vector<8x64xf32>,
    %c0_149 = arith.constant 0 : index
    %c0_150 = arith.constant 0 : index
    %345 = vector.load %arg10[%c0_149, %c0_150] : memref<8x128xf32, #tpu.memory_space<vmem>>, vector<8x128xf32>
    %cst_151 = arith.constant dense<0.000000e+00> : vector<8x256xf32>
    %346 = tpu.matmul %345, %1, %cst_151 {dimension_numbers = #tpu.dot_dimension_numbers<[1], [0], [0], [1], [0, 0, 1, 1], [], []>} : vector<8x128xf32>, vector<128x256xf32>, vector<8x256xf32> -> vector<8x256xf32>
    %347 = arith.addf %346, %7 : vector<8x256xf32>
    %348 = vector.extract_strided_slice %347 {offsets = [0, 0], sizes = [8, 192], strides = [1, 1]} : vector<8x256xf32> to vector<8x192xf32>
    %349 = arith.negf %348 : vector<8x192xf32>
    %350 = math.exp %349 : vector<8x192xf32>
    %cst_152 = arith.constant 1.000000e+00 : f32
    %351 = vector.broadcast %cst_152 : f32 to vector<8x192xf32>
    %352 = arith.addf %351, %350 : vector<8x192xf32>
    %353 = arith.divf %351, %352 : vector<8x192xf32>
    %354 = vector.extract_strided_slice %347 {offsets = [0, 192], sizes = [8, 64], strides = [1, 1]} : vector<8x256xf32> to vector<8x64xf32>
    %355 = math.tanh %354 : vector<8x64xf32>
    %356 = vector.extract_strided_slice %353 {offsets = [0, 0], sizes = [8, 64], strides = [1, 1]} : vector<8x192xf32> to vector<8x64xf32>
    %357 = vector.extract_strided_slice %353 {offsets = [0, 64], sizes = [8, 64], strides = [1, 1]} : vector<8x192xf32> to vector<8x64xf32>
    %358 = vector.extract_strided_slice %353 {offsets = [0, 128], sizes = [8, 64], strides = [1, 1]} : vector<8x192xf32> to vector<8x64xf32>
    %359 = arith.mulf %357, %317 : vector<8x64xf32>
    %360 = arith.mulf %356, %355 : vector<8x64xf32>
    %361 = arith.addf %359, %360 : vector<8x64xf32>
    %362 = math.tanh %361 : vector<8x64xf32>
    %363 = arith.mulf %358, %362 : vector<8x64xf32>
    %c0_153 = arith.constant 0 : index
    %c0_154 = arith.constant 0 : index
    %364 = vector.load %arg6[%c0_153, %c0_154] : memref<64x10xf32, #tpu.memory_space<vmem>>, vector<64x10xf32>
    %cst_155 = arith.constant dense<0.000000e+00> : vector<8x10xf32>
    %365 = tpu.matmul %363, %364, %cst_155 {dimension_numbers = #tpu.dot_dimension_numbers<[1], [0], [0], [1], [0, 0, 1, 1], [], []>} : vector<8x64xf32>, vector<64x10xf32>, vector<8x10xf32> -> vector<8x10xf32>
    %c0_156 = arith.constant 0 : index
    %c0_157 = arith.constant 0 : index
    %366 = vector.load %arg7[%c0_156, %c0_157] : memref<1x10xf32, #tpu.memory_space<vmem>>, vector<1x10xf32>
    %367 = vector.broadcast %366 : vector<1x10xf32> to vector<8x10xf32>
    %368 = arith.addf %365, %367 : vector<8x10xf32>
    %c0_158 = arith.constant 0 : index
    %c0_159 = arith.constant 0 : index
    %369 = vector.load %arg8[%c0_158, %c0_159] : memref<8x10xf32, #tpu.memory_space<vmem>>, vector<8x10xf32>
    tpu.vector_store %arg8[%c0_158, %c0_159], %368 {strides = array<i32>} : memref<8x10xf32, #tpu.memory_space<vmem>>, vector<8x10xf32>,
    return
  }
  func.func @transform_0(%arg0: i32) -> (i32, i32, i32) {
    %c0_i32 = arith.constant 0 : i32
    %c0_i32_0 = arith.constant 0 : i32
    %c0_i32_1 = arith.constant 0 : i32
    return %arg0, %c0_i32, %c0_i32_0 : i32, i32, i32
  }
  func.func @transform_1(%arg0: i32) -> (i32, i32) {
    %c0_i32 = arith.constant 0 : i32
    %c0_i32_0 = arith.constant 0 : i32
    %c0_i32_1 = arith.constant 0 : i32
    return %c0_i32, %c0_i32_0 : i32, i32
  }
  func.func @transform_2(%arg0: i32) -> (i32, i32) {
    %c0_i32 = arith.constant 0 : i32
    %c0_i32_0 = arith.constant 0 : i32
    %c0_i32_1 = arith.constant 0 : i32
    return %c0_i32, %c0_i32_0 : i32, i32
  }
  func.func @transform_3(%arg0: i32) -> (i32, i32) {
    %c0_i32 = arith.constant 0 : i32
    %c0_i32_0 = arith.constant 0 : i32
    %c0_i32_1 = arith.constant 0 : i32
    return %c0_i32, %c0_i32_0 : i32, i32
  }
  func.func @transform_4(%arg0: i32) -> (i32, i32) {
    %c0_i32 = arith.constant 0 : i32
    %c0_i32_0 = arith.constant 0 : i32
    %c0_i32_1 = arith.constant 0 : i32
    return %c0_i32, %c0_i32_0 : i32, i32
  }
  func.func @transform_5(%arg0: i32) -> (i32, i32) {
    %c0_i32 = arith.constant 0 : i32
    %c0_i32_0 = arith.constant 0 : i32
    %c0_i32_1 = arith.constant 0 : i32
    return %c0_i32, %c0_i32_0 : i32, i32
  }
  func.func @transform_6(%arg0: i32) -> (i32, i32) {
    %c0_i32 = arith.constant 0 : i32
    %c0_i32_0 = arith.constant 0 : i32
    %c0_i32_1 = arith.constant 0 : i32
    return %c0_i32, %c0_i32_0 : i32, i32
  }
  func.func @transform_7(%arg0: i32) -> (i32, i32) {
    %c0_i32 = arith.constant 0 : i32
    %c0_i32_0 = arith.constant 0 : i32
    return %arg0, %c0_i32 : i32, i32
  }
}

</mosaic_0001>

<bundles_post_ra>
// kernel: lstm_kws_forward.1
= control target key start
LH: loop header
LB: loop body
LE: loop exit
PB: predicated region body
PF: predicated region fallthrough
CT: control target
= control target key end

     0   :  { %12 = vsyncpa [#allocation5], 0  ;;  %s4029_s0 = inlined_call_operand.vmem [shape: f32[8,8,10], index: 0, kind: input, shape index: {}]   ;;  %s4030_s1 = inlined_call_operand.vmem [shape: f32[74,256], index: 1, kind: input, shape index: {}]   ;;  %s4031_s2 = inlined_call_operand.hbm [shape: f32[1,256], index: 2, kind: input, shape index: {}]   ;;  %s4032_s3 = inlined_call_operand.hbm [shape: f32[128,256], index: 3, kind: input, shape index: {}]   ;;  %s4033_s4 = inlined_call_operand.hbm [shape: f32[1,256], index: 4, kind: input, shape index: {}]   ;;  %s4034_s5 = inlined_call_operand.vmem [shape: f32[64,10], index: 5, kind: input, shape index: {}]   ;;  %s4035_s6 = inlined_call_operand.vmem [shape: f32[1,10], index: 6, kind: input, shape index: {}]   ;;  %s4036_s7 = inlined_call_operand.vmem [shape: f32[8,10], index: 7, kind: output, shape index: {}]  }
   0x1   :  { %13 = vsyncpa [#allocation7], 0  ;;  %s3048_s24 = smov [#allocation6]   ;;  %s2978_s28 = scalar_lea.hbm %s4032_s3, 4096 }
   0x2   :  { %s33_s25 = sshll.u32 %s3048_s24, 4  ;;  %p2979_p0 = scmp.ne.s32.totalorder %s4032_s3, %s2978_s28  ;;  %s34_s25 = int_to_ptr.vmem [resolvable:$true] %s33_s25 }
   0x3   :  { %p2982_p1 = scmp.lt.u32.totalorder %s2978_s28, %s4032_s3 }
   0x5   :  { %p2984_p2 = pnand %p2982_p1, %p2979_p0 }
   0x7   :  { %2987 = shalt.err (!%p2984_p2)
}
   0x8   :  { %s2988_s10 = scalar_lea.vmem %s34_s25, 4096  ;;  %p2993_p4 = scmp.lt.s32.totalorder %s34_s25, %s34_s25 }
   0x9   :  { %p2989_p3 = scmp.ne.s32.totalorder %s34_s25, %s2988_s10  ;;  %p2994_p5 = scmp.lt.s32.totalorder %s2988_s10, %s2988_s10 }
   0xb   :  { %p2995_p6 = por %p2994_p5, %p2993_p4 }
   0xd   :  { %p2996_p7 = pnand %p2995_p6, %p2989_p3 }
   0xf   :  { %2999 = shalt.err (!%p2996_p7)
}
  0x10   :  { %s3049_s11 = smov 256   ;;  %s3050_s12 = smov 16  }
  0x11   :  { %39 = dma.hbm_to_vmem [thread:$0]  %s4032_s3, 4096, %s34_s25, [#allocation7], %s3049_s11, %s3049_s11, %s3050_s12  }
  0x12   :  { %s3051_s15 = smov [#allocation4]   ;;  %s3052_s17 = smov [#allocation8]  }
  0x13   :  { %s24_s16 = sshll.u32 %s3051_s15, 4  ;;  %s46_s18 = sshll.u32 %s3052_s17, 4  ;;  %s25_s16 = int_to_ptr.vmem [resolvable:$true] %s24_s16  ;;  %s47_s18 = int_to_ptr.vmem [resolvable:$true] %s46_s18 }
  0x14   :  { %s3000_s21 = scalar_lea.hbm %s4031_s2, 32 }
  0x15   :  { %p3001_p8 = scmp.ne.s32.totalorder %s4031_s2, %s3000_s21  ;;  %p3004_p9 = scmp.lt.u32.totalorder %s3000_s21, %s4031_s2 }
  0x17   :  { %p3006_p10 = pnand %p3004_p9, %p3001_p8 }
  0x19   :  { %3009 = shalt.err (!%p3006_p10)
}
  0x1a   :  { %s3010_s3 = scalar_lea.vmem %s25_s16, 32  ;;  %p3015_p12 = scmp.lt.s32.totalorder %s25_s16, %s25_s16 }
  0x1b   :  { %p3011_p11 = scmp.ne.s32.totalorder %s25_s16, %s3010_s3  ;;  %p3016_p13 = scmp.lt.s32.totalorder %s3010_s3, %s3010_s3 }
  0x1d   :  { %p3017_p0 = por %p3016_p13, %p3015_p12 }
  0x1f   :  { %p3018_p1 = pnand %p3017_p0, %p3011_p11 }
  0x21   :  { %3021 = shalt.err (!%p3018_p1)
}
  0x22   :  { %27 = dma.hbm_to_vmem [thread:$0]  %s4031_s2, 32, %s25_s16, [#allocation5]  }
  0x23   :  { %s3022_s30 = scalar_lea.hbm %s4033_s4, 32 }
  0x24   :  { %p3023_p2 = scmp.ne.s32.totalorder %s4033_s4, %s3022_s30  ;;  %p3026_p3 = scmp.lt.u32.totalorder %s3022_s30, %s4033_s4 }
  0x26   :  { %p3028_p4 = pnand %p3026_p3, %p3023_p2 }
  0x28   :  { %3031 = shalt.err (!%p3028_p4)
}
  0x29   :  { %s3032_s12 = scalar_lea.vmem %s47_s18, 32  ;;  %p3037_p6 = scmp.lt.s32.totalorder %s47_s18, %s47_s18 }
  0x2a   :  { %p3033_p5 = scmp.ne.s32.totalorder %s47_s18, %s3032_s12  ;;  %p3038_p7 = scmp.lt.s32.totalorder %s3032_s12, %s3032_s12 }
  0x2c   :  { %p3039_p8 = por %p3038_p7, %p3037_p6 }
  0x2e   :  { %p3040_p9 = pnand %p3039_p8, %p3033_p5 }
  0x30   :  { %3043 = shalt.err (!%p3040_p9)
}
  0x31   :  { %49 = dma.hbm_to_vmem [thread:$0]  %s4033_s4, 32, %s47_s18, [#allocation7]  }
  0x32   :  { %3044 = dma.done.wait [#allocation5], 32  }
  0x33   :  { %3045 = vsyncadd [#allocation5], 4294967264 }
  0x34   :  { %3046 = dma.done.wait [#allocation7], 4128  }
  0x35   :  { %3047 = vsyncadd [#allocation7], 4294963168  ;;  %v3053_v0 = vmov 0.0   ;;  %v64_v1 = vld [vmem:[%s4030_s1 + $0x8] sm:$0xff]  ;;  %v66_v2 = vld [vmem:[%s4030_s1 + $0x18] sm:$0xff]  ;;  %vm186_vm0 = vcmask 1041408   ;;  %v117_v55 = vlaneseq }
  0x36   :  { %257 = vmatprep.mubr.f32.mxu0 %v3053_v0  ;;  %363 = vmatprep.mubr.f32.mxu1 %v3053_v0  ;;  %v63_v3 = vld [vmem:[%s4030_s1] sm:$0xff]  ;;  %v3146_v4 = vpack.c.bf16 %v66_v2, %v64_v1  ;;  %v65_v5 = vld [vmem:[%s4030_s1 + $0x10] sm:$0xff]  ;;  %v68_v6 = vld [vmem:[%s4030_s1 + $0x28] sm:$0xff]  ;;  %vm156_vm1 = vcmask 1041409   ;;  %vm159_vm2 = vcmask 1042434   ;;  %vm162_vm3 = vcmask 1043459  }
  0x37   :  { %v70_v7 = vld [vmem:[%s4030_s1 + $0x38] sm:$0xff]  ;;  %v3157_v8 = vpack.c.bf16 %v65_v5, %v63_v3  ;;  %v67_v10 = vld [vmem:[%s4030_s1 + $0x20] sm:$0xff]  ;;  %v69_v11 = vld [vmem:[%s4030_s1 + $0x30] sm:$0xff]  ;;  %vm165_vm4 = vcmask 1044484   ;;  %vm168_vm5 = vcmask 1045509   ;;  %vm171_vm6 = vcmask 1046534  }
  0x38   :  { %v3159_v9 = vpack.c.bf16 %v70_v7, %v68_v6  ;;  %v72_v12 = vld [vmem:[%s4030_s1 + $0x48] sm:$0xff]  ;;  %2332 = vmatprep.subr.bf16.mxu0 %v3146_v4  ;;  %v74_v13 = vld [vmem:[%s4030_s1 + $0x58] sm:$0xff]  ;;  %v3175_v14 = vpack.c.bf16 %v69_v11, %v67_v10  ;;  %v71_v16 = vld [vmem:[%s4030_s1 + $0x40] sm:$0xff]  ;;  %vm3054_vm7 = vmmov 1   ;;  %vm174_vm9 = vcmask 1047559   ;;  %s3056_s9 = smov 10  }
  0x39   :  { %2334 = vmatpush1.bf16.msra.mxu0 %v3157_v8  ;;  %v3178_v15 = vpack.c.bf16 %v74_v13, %v72_v12  ;;  %v73_v17 = vld [vmem:[%s4030_s1 + $0x50] sm:$0xff]  ;;  %v76_v18 = vld [vmem:[%s4030_s1 + $0x68] sm:$0xff]  ;;  %v78_v19 = vld [vmem:[%s4030_s1 + $0x78] sm:$0xff]  ;;  %vm177_vm10 = vcmask 80896   ;;  %vm179_vm11 = vcmask 605264   ;;  %vm182_vm12 = vcmask 605184  }
  0x3a   :  { %2336 = vmatprep.subr.bf16.mxu0 %v3159_v9  ;;  %v75_v20 = vld [vmem:[%s4030_s1 + $0x60] sm:$0xff]  ;;  %v140_v21 = vld [vmem:[%s4029_s0 + $0x8] sm:$0x1]  ;;  %v141_v22 = vld [vmem:[%s4029_s0 + $0x10] sm:$0x1]  ;;  %v3205_v24 = vpack.c.bf16 %v73_v17, %v71_v16  ;;  %v3217_v28 = vpack.c.bf16 %v78_v19, %v76_v18  ;;  %v3287_v56 = vshrl.u32 %v117_v55, 7 }
  0x3b   :  { %v142_v23 = vld [vmem:[%s4029_s0 + $0x18] sm:$0x1]  ;;  %v139_v25 = vld [vmem:[%s4029_s0] sm:$0x1]  ;;  %v144_v27 = vld [vmem:[%s4029_s0 + $0x28] sm:$0x1] }
  0x3c   :  { %v143_v26 = vld [vmem:[%s4029_s0 + $0x20] sm:$0x1]  ;;  %v77_v29 = vld [vmem:[%s4030_s1 + $0x70] sm:$0xff]  ;;  %v155_v31 = vrot.slane %v140_v21, 7  ;;  %v158_v32 = vrot.slane %v141_v22, 6  ;;  %v161_v33 = vrot.slane %v142_v23, 5  ;;  %vm3250_vm8 = vmpackc.low %vm186_vm0, %vm3054_vm7 }
  0x3d   :  { %2338 = vmatpush1.bf16.msra.mxu0 %v3175_v14  ;;  %v145_v30 = vld [vmem:[%s4029_s0 + $0x30] sm:$0x1]  ;;  %v80_v34 = vld [vmem:[%s4030_s1 + $0x88] sm:$0xff]  ;;  %v82_v35 = vld [vmem:[%s4030_s1 + $0x98] sm:$0x3]  ;;  %v164_v37 = vrot.slane %v143_v26, 4  ;;  %v3236_v40 = vpack.c.bf16 %v77_v29, %v75_v20 }
  0x3e   :  { %2340 = vmatprep.subr.bf16.mxu0 %v3178_v15  ;;  %v146_v36 = vld [vmem:[%s4029_s0 + $0x38] sm:$0x1]  ;;  %v157_v38 = vsel %vm156_vm1, %v155_v31, %v139_v25  ;;  %v167_v39 = vrot.slane %v144_v27, 3  ;;  %v170_v42 = vrot.slane %v145_v30, 2  ;;  %v3240_v43 = vpack.c.bf16 %v82_v35, %v80_v34  ;;  %v79_v44 = vld [vmem:[%s4030_s1 + $0x80] sm:$0xff]  ;;  %v84_v13 = vld [vmem:[#allocation6 + $0x8] sm:$0xff] }
  0x3f   :  { %v160_v41 = vsel %vm159_vm2, %v158_v32, %v157_v38  ;;  %v81_v45 = vld [vmem:[%s4030_s1 + $0x90] sm:$0x3]  ;;  %v173_v47 = vrot.slane %v146_v36, 1  ;;  %v123_v57 = vsub.s32 1, %v3287_v56  ;;  %v115_v58 = vld [vmem:[#allocation4] sm:$0x3] }
  0x40   :  { %v163_v46 = vsel %vm162_vm3, %v161_v33, %v160_v41  ;;  %v3257_v51 = vpack.c.bf16 %v81_v45, %v79_v44  ;;  %s3055_s1 = smov 64   ;;  %v119_v1 = vsub.s32 0, %v3287_v56  ;;  %v86_v16 = vld [vmem:[#allocation6 + $0x18] sm:$0xff]  ;;  %v83_v17 = vld [vmem:[#allocation6] sm:$0xff]  ;;  %v85_v19 = vld [vmem:[#allocation6 + $0x10] sm:$0xff]  ;;  %vm294_vm13 = vcmask 523264  }
  0x41   :  { %2342 = vmatpush1.bf16.msra.mxu0 %v3205_v24  ;;  %v166_v49 = vsel %vm165_vm4, %v164_v37, %v163_v46  ;;  %v3292_v59 = vrot.slane %v115_v58, %v123_v57  ;;  %v3306_v18 = vpack.c.bf16 %v86_v16, %v84_v13  ;;  %v88_v20 = vld [vmem:[#allocation6 + $0x28] sm:$0xff]  ;;  %v90_v21 = vld [vmem:[#allocation6 + $0x38] sm:$0xff]  ;;  %v3308_v22 = vpack.c.bf16 %v85_v19, %v83_v17  ;;  %v87_v25 = vld [vmem:[#allocation6 + $0x20] sm:$0xff] }
  0x42   :  { %2344 = vmatprep.subr.bf16.mxu0 %v3217_v28  ;;  %v169_v50 = vsel %vm168_vm5, %v167_v39, %v166_v49  ;;  %v3302_v2 = vrot.slane %v115_v58, %v119_v1  ;;  %v3310_v23 = vpack.c.bf16 %v90_v21, %v88_v20  ;;  %v89_v26 = vld [vmem:[#allocation6 + $0x30] sm:$0xff]  ;;  %v92_v27 = vld [vmem:[#allocation6 + $0x48] sm:$0xff]  ;;  %v94_v29 = vld [vmem:[#allocation6 + $0x58] sm:$0xff]  ;;  %vm296_vm14 = vcmask 1048064  }
  0x43   :  { %v172_v52 = vsel %vm171_vm6, %v170_v42, %v169_v50  ;;  %2354 = vmatprep.subr.bf16.mxu1 %v3306_v18  ;;  %v3314_v30 = vpack.c.bf16 %v89_v26, %v87_v25  ;;  %v3317_v31 = vpack.c.bf16 %v94_v29, %v92_v27  ;;  %v91_v32 = vld [vmem:[#allocation6 + $0x40] sm:$0xff]  ;;  %v93_v33 = vld [vmem:[#allocation6 + $0x50] sm:$0xff]  ;;  %v96_v34 = vld [vmem:[#allocation6 + $0x68] sm:$0xff]  ;;  %vm3058_vm15 = vmmov 0  }
  0x44   :  { %v175_v53 = vsel %vm174_vm9, %v173_v47, %v172_v52  ;;  %2356 = vmatpush1.bf16.msra.mxu1 %v3308_v22  ;;  %v98_v35 = vld [vmem:[#allocation6 + $0x78] sm:$0xff]  ;;  %v3320_v36 = vpack.c.bf16 %v93_v33, %v91_v32  ;;  %v95_v38 = vld [vmem:[#allocation6 + $0x60] sm:$0xff]  ;;  %v97_v39 = vld [vmem:[#allocation6 + $0x70] sm:$0xff] }
  0x45   :  { %2346 = vmatpush1.bf16.msra.mxu0 %v3236_v40  ;;  %178 = vst.msk [vmem:[#allocation2] sm:$0xff] %vm177_vm10, %v175_v53  ;;  %2358 = vmatprep.subr.bf16.mxu1 %v3310_v23  ;;  %v3323_v37 = vpack.c.bf16 %v98_v35, %v96_v34  ;;  %v100_v41 = vld [vmem:[#allocation6 + $0x88] sm:$0xff]  ;;  %v102_v42 = vld [vmem:[#allocation6 + $0x98] sm:$0xff]  ;;  %v3326_v44 = vpack.c.bf16 %v97_v39, %v95_v38  ;;  %v99_v46 = vld [vmem:[#allocation6 + $0x80] sm:$0xff] }
  0x46   :  { %2349 = vmatprep.subr.msk.bf16.mxu0 %vm3250_vm8, %v3240_v43  ;;  %180 = vst.msk [vmem:[#allocation2] sm:$0xff] %vm179_vm11, %v3053_v0  ;;  %v3329_v45 = vpack.c.bf16 %v102_v42, %v100_v41  ;;  %v101_v47 = vld [vmem:[#allocation6 + $0x90] sm:$0xff]  ;;  %v104_v49 = vld [vmem:[#allocation6 + $0xa8] sm:$0xff]  ;;  %v106_v50 = vld [vmem:[#allocation6 + $0xb8] sm:$0xff] }
  0x47   :  { %v3332_v52 = vpack.c.bf16 %v101_v47, %v99_v46  ;;  %v3335_v53 = vpack.c.bf16 %v106_v50, %v104_v49  ;;  %v105_v55 = vld [vmem:[#allocation6 + $0xb0] sm:$0xff]  ;;  %v114_v13 = vld [vmem:[#allocation6 + $0xf8] sm:$0xff]  ;;  %v111_v16 = vld [vmem:[#allocation6 + $0xe0] sm:$0xff] }
  0x48   :  { %2360 = vmatpush1.bf16.msra.mxu1 %v3314_v30  ;;  %v113_v19 = vld [vmem:[#allocation6 + $0xf0] sm:$0xff]  ;;  %v400_v21 = vld [vmem:[%s4029_s0 + $0x1] sm:$0x1]  ;;  %v401_v25 = vld [vmem:[%s4029_s0 + $0x9] sm:$0x1] }
  0x49   :  { %2352 = vmatpush1.bf16.msk.msra.mxu0 %vm3250_vm8, %v3257_v51  ;;  %2362 = vmatprep.subr.bf16.mxu1 %v3317_v31  ;;  %v3353_v20 = vpack.c.bf16 %v113_v19, %v111_v16  ;;  %v402_v26 = vld [vmem:[%s4029_s0 + $0x11] sm:$0x1]  ;;  %v403_v29 = vld [vmem:[%s4029_s0 + $0x19] sm:$0x1]  ;;  %v404_v32 = vld [vmem:[%s4029_s0 + $0x21] sm:$0x1] }
  0x4a   :  { %2386 = vmatprep.subr.bf16.mxu0 %v3146_v4  ;;  %v405_v33 = vld [vmem:[%s4029_s0 + $0x29] sm:$0x1]  ;;  %v406_v34 = vld [vmem:[%s4029_s0 + $0x31] sm:$0x1]  ;;  %v416_v35 = vrot.slane %v401_v25, 7  ;;  %v418_v38 = vrot.slane %v402_v26, 6 }
  0x4b   :  { %v407_v39 = vld [vmem:[%s4029_s0 + $0x39] sm:$0x1]  ;;  %v420_v41 = vrot.slane %v403_v29, 5  ;;  %v422_v42 = vrot.slane %v404_v32, 4  ;;  %v424_v47 = vrot.slane %v405_v33, 3  ;;  %v426_v50 = vrot.slane %v406_v34, 2 }
  0x4c   :  { %2364 = vmatpush1.bf16.msra.mxu1 %v3320_v36  ;;  %v417_v46 = vsel %vm156_vm1, %v416_v35, %v400_v21  ;;  %v127_v26 = vld [vmem:[#allocation8] sm:$0x3] }
  0x4d   :  { %v181_v54 = vld [vmem:[#allocation2] sm:$0xff]  ;;  %2366 = vmatprep.subr.bf16.mxu1 %v3323_v37  ;;  %v419_v49 = vsel %vm159_vm2, %v418_v38, %v417_v46  ;;  %v3438_v35 = vrot.slane %v127_v26, %v119_v1 }
  0x4e   :  { %2247 = vmatmul.mubr.msk.f32.vlgmr.msra.gmra.mrb[0].mxu0 %vm182_vm12, %v181_v54  ;;  %v103_v54 = vld [vmem:[#allocation6 + $0xa0] sm:$0xff] }
  0x4f   :  { %2388 = vmatpush1.bf16.msra.mxu0 %v3157_v8  ;;  %505 = vmatprep.mubr.f32.mxu0 %v3053_v0 }
  0x50   :  { %2390 = vmatprep.subr.bf16.mxu0 %v3159_v9  ;;  %2368 = vmatpush1.bf16.msra.mxu1 %v3326_v44 }
  0x51   :  { %2370 = vmatprep.subr.bf16.mxu1 %v3329_v45 }
  0x53   :  { %2392 = vmatpush1.bf16.msra.mxu0 %v3175_v14 }
  0x54   :  { %2394 = vmatprep.subr.bf16.mxu0 %v3178_v15  ;;  %2372 = vmatpush1.bf16.msra.mxu1 %v3332_v52 }
  0x55   :  { %2374 = vmatprep.subr.bf16.mxu1 %v3335_v53 }
  0x57   :  { %2396 = vmatpush1.bf16.msra.mxu0 %v3205_v24 }
  0x58   :  { %2398 = vmatprep.subr.bf16.mxu0 %v3217_v28 }
  0x5b   :  { %2400 = vmatpush1.bf16.msra.mxu0 %v3236_v40 }
  0x5c   :  { %2403 = vmatprep.subr.msk.bf16.mxu0 %vm3250_vm8, %v3240_v43 }
  0x5f   :  { %2406 = vmatpush1.bf16.msk.msra.mxu0 %vm3250_vm8, %v3257_v51 }
  0x60   :  { %2440 = vmatprep.subr.bf16.mxu0 %v3146_v4 }
 0x121   :  { %v259_v60 = vpop.f32.mrb[0].mxu0 }
 0x122   :  { %v261_v61 = vpop.f32.mrb[1].mxu0  ;;  %v260_v3 = vadd.f32 %v259_v60, %v3302_v2  ;;  %v3339_v60 = vpack.c.bf16 %v105_v55, %v103_v54  ;;  %v421_v54 = vsel %vm162_vm3, %v420_v41, %v419_v49  ;;  %v428_v55 = vrot.slane %v407_v39, 1 }
 0x123   :  { %v3295_v62 = vadd.f32 %v261_v61, %v3292_v59 }
 0x124   :  { %v2248_v5 = vmul.f32 -1.442695, %v260_v3  ;;  %2376 = vmatpush1.bf16.msra.mxu1 %v3339_v60  ;;  %v108_v3 = vld [vmem:[#allocation6 + $0xc8] sm:$0xff] }
 0x125   :  { %2786 = vtanh.f32 %v3295_v62 }
 0x126   :  { %2788 = vpow2.f32 %v2248_v5  ;;  %v110_v5 = vld [vmem:[#allocation6 + $0xd8] sm:$0xff] }
 0x12f   :  { %v2787_v63 = vpop.eup %2786 }
 0x130   :  { %279 = vrot.lane.b32.xlu0 %v2787_v63, %s3055_s1  ;;  %v2789_v6 = vpop.eup %2788 }
 0x131   :  { %v270_v7 = vadd.f32 1.0, %v2789_v6  ;;  %v3344_v6 = vpack.c.bf16 %v110_v5, %v108_v3 }
 0x133   :  { %2790 = vrcp.f32 %v270_v7  ;;  %v107_v7 = vld [vmem:[#allocation6 + $0xc0] sm:$0xff]  ;;  %2378 = vmatprep.subr.bf16.mxu1 %v3344_v6 }
 0x13d   :  { %v2791_v10 = vpop.eup %2790 }
 0x13e   :  { %v277_v58 = vmul.f32 0.0, %v2791_v10 }
 0x1a2   :  { %v280_v11 = vpop.permute.xlu0 %279 }
 0x1a3   :  { %v282_v12 = vmul.f32 %v2791_v10, %v280_v11  ;;  %v109_v11 = vld [vmem:[#allocation6 + $0xd0] sm:$0xff]  ;;  %v112_v10 = vld [vmem:[#allocation6 + $0xe8] sm:$0xff] }
 0x1a4   :  { %v3351_v17 = vpack.c.bf16 %v114_v13, %v112_v10 }
 0x1a5   :  { %284 = vrot.lane.b32.xlu0 %v282_v12, %s3055_s1  ;;  %v3347_v12 = vpack.c.bf16 %v109_v11, %v107_v7  ;;  %v2249_v7 = vmul.f32 -1.442695, %v3295_v62 }
 0x1a7   :  { %2380 = vmatpush1.bf16.msra.mxu1 %v3347_v12 }
 0x1a8   :  { %2382 = vmatprep.subr.bf16.mxu1 %v3351_v17 }
 0x1ab   :  { %2384 = vmatpush1.bf16.msra.mxu1 %v3353_v20 }
 0x1ac   :  { %2408 = vmatprep.subr.bf16.mxu1 %v3306_v18 }
 0x217   :  { %v285_v61 = vpop.permute.xlu0 %284 }
 0x218   :  { %v3341_v63 = vadd.f32 %v285_v61, %v277_v58  ;;  %v423_v58 = vsel %vm165_vm4, %v422_v42, %v421_v54 }
 0x219   :  { %v425_v61 = vsel %vm168_vm5, %v424_v47, %v423_v58 }
 0x21a   :  { %2792 = vtanh.f32 %v3341_v63  ;;  %v427_v3 = vsel %vm171_vm6, %v426_v50, %v425_v61 }
 0x21b   :  { %v429_v5 = vsel %vm174_vm9, %v428_v55, %v427_v3  ;;  %2794 = vpow2.f32 %v2249_v7 }
 0x21c   :  { %431 = vst.msk [vmem:[#allocation2] sm:$0xff] %vm177_vm10, %v429_v5 }
 0x224   :  { %v2793_v27 = vpop.eup %2792 }
 0x225   :  { %290 = vrot.lane.b32.xlu1 %v2793_v27, %s3055_s1  ;;  %v2795_v11 = vpop.eup %2794  ;;  %v3432_v27 = vrot.slane %v127_v26, %v123_v57 }
 0x226   :  { %v271_v10 = vadd.f32 1.0, %v2795_v11 }
 0x228   :  { %2796 = vrcp.f32 %v271_v10 }
 0x232   :  { %v2797_v13 = vpop.eup %2796 }
 0x297   :  { %v291_v16 = vpop.permute.xlu1 %290 }
 0x298   :  { %v293_v19 = vmul.f32 %v2797_v13, %v291_v16 }
 0x29a   :  { %295 = vst.msk [vmem:[#allocation3] sm:$0xff] %vm294_vm13, %v293_v19  ;;  %433 = vrot.lane.b32.xlu1 %v293_v19, %s3056_s9 }
 0x29b   :  { %297 = vst.msk [vmem:[#allocation3] sm:$0xff] %vm296_vm14, %v3053_v0 }
 0x2a2   :  { %v298_v21 = vld [vmem:[#allocation3] sm:$0xff] }
 0x2a3   :  { %364 = vmatmul.mubr.f32.vlgmr.msra.gmra.mrb[0].mxu1 %v298_v21 }
 0x2a4   :  { %2410 = vmatpush1.bf16.msra.mxu1 %v3308_v22  ;;  %613 = vmatprep.mubr.f32.mxu1 %v3053_v0 }
 0x2a5   :  { %2412 = vmatprep.subr.bf16.mxu1 %v3310_v23 }
 0x2a8   :  { %2414 = vmatpush1.bf16.msra.mxu1 %v3314_v30 }
 0x2a9   :  { %2416 = vmatprep.subr.bf16.mxu1 %v3317_v31 }
 0x2ac   :  { %2418 = vmatpush1.bf16.msra.mxu1 %v3320_v36 }
 0x2ad   :  { %2420 = vmatprep.subr.bf16.mxu1 %v3323_v37 }
 0x2b0   :  { %2422 = vmatpush1.bf16.msra.mxu1 %v3326_v44 }
 0x2b1   :  { %2424 = vmatprep.subr.bf16.mxu1 %v3329_v45 }
 0x2b4   :  { %2426 = vmatpush1.bf16.msra.mxu1 %v3332_v52 }
 0x2b5   :  { %2428 = vmatprep.subr.bf16.mxu1 %v3335_v53 }
 0x2b8   :  { %2430 = vmatpush1.bf16.msra.mxu1 %v3339_v60 }
 0x2b9   :  { %2432 = vmatprep.subr.bf16.mxu1 %v3344_v6 }
 0x2bc   :  { %2434 = vmatpush1.bf16.msra.mxu1 %v3347_v12 }
 0x2bd   :  { %2436 = vmatprep.subr.bf16.mxu1 %v3351_v17 }
 0x2c0   :  { %2438 = vmatpush1.bf16.msra.mxu1 %v3353_v20 }
 0x2c1   :  { %2494 = vmatprep.subr.bf16.mxu1 %v3146_v4 }
 0x30c   :  { %v434_v62 = vpop.permute.xlu1 %433 }
 0x30d   :  { %436 = vst.msk [vmem:[#allocation2] sm:$0xff] %vm179_vm11, %v434_v62 }
 0x314   :  { %v437_v25 = vld [vmem:[#allocation2] sm:$0xff] }
 0x315   :  { %2254 = vmatmul.mubr.msk.f32.vlgmr.msra.gmra.mrb[2].mxu0 %vm182_vm12, %v437_v25 }
 0x316   :  { %2442 = vmatpush1.bf16.msra.mxu0 %v3157_v8  ;;  %755 = vmatprep.mubr.f32.mxu0 %v3053_v0 }
 0x317   :  { %2444 = vmatprep.subr.bf16.mxu0 %v3159_v9 }
 0x31a   :  { %2446 = vmatpush1.bf16.msra.mxu0 %v3175_v14 }
 0x31b   :  { %2448 = vmatprep.subr.bf16.mxu0 %v3178_v15 }
 0x31e   :  { %2450 = vmatpush1.bf16.msra.mxu0 %v3205_v24 }
 0x31f   :  { %2452 = vmatprep.subr.bf16.mxu0 %v3217_v28 }
 0x322   :  { %2454 = vmatpush1.bf16.msra.mxu0 %v3236_v40 }
 0x323   :  { %2457 = vmatprep.subr.msk.bf16.mxu0 %vm3250_vm8, %v3240_v43 }
 0x326   :  { %2460 = vmatpush1.bf16.msk.msra.mxu0 %vm3250_vm8, %v3257_v51 }
 0x327   :  { %2462 = vmatprep.subr.bf16.mxu0 %v3306_v18 }
 0x376   :  { %v365_v29 = vpop.f32.mrb[0].mxu1 }
 0x377   :  { %v367_v32 = vpop.f32.mrb[1].mxu1  ;;  %v366_v38 = vadd.f32 %v365_v29, %v3438_v35 }
 0x378   :  { %v368_v33 = vadd.f32 %v367_v32, %v3432_v27  ;;  %v650_v32 = vld [vmem:[%s4029_s0 + $0x2] sm:$0x1] }
 0x379   :  { %v2250_v39 = vmul.f32 -1.442695, %v366_v38  ;;  %v653_v38 = vld [vmem:[%s4029_s0 + $0x1a] sm:$0x1] }
 0x37a   :  { %2798 = vtanh.f32 %v368_v33  ;;  %v2251_v19 = vmul.f32 -1.442695, %v368_v33  ;;  %v652_v33 = vld [vmem:[%s4029_s0 + $0x12] sm:$0x1] }
 0x37b   :  { %2800 = vpow2.f32 %v2250_v39  ;;  %v654_v39 = vld [vmem:[%s4029_s0 + $0x22] sm:$0x1] }
 0x384   :  { %v2799_v34 = vpop.eup %2798 }
 0x385   :  { %385 = vrot.lane.b32.xlu0 %v2799_v34, %s3055_s1  ;;  %v2801_v41 = vpop.eup %2800  ;;  %v651_v34 = vld [vmem:[%s4029_s0 + $0xa] sm:$0x1] }
 0x386   :  { %v376_v57 = vadd.f32 1.0, %v2801_v41  ;;  %v655_v41 = vld [vmem:[%s4029_s0 + $0x2a] sm:$0x1] }
 0x3e8   :  { %v507_v42 = vpop.f32.mrb[2].mxu0 }
 0x3e9   :  { %v509_v46 = vpop.f32.mrb[3].mxu0  ;;  %v508_v54 = vadd.f32 %v507_v42, %v3302_v2 }
 0x3ea   :  { %v3442_v47 = vadd.f32 %v509_v46, %v3292_v59  ;;  %v656_v46 = vld [vmem:[%s4029_s0 + $0x32] sm:$0x1] }
 0x3eb   :  { %v2255_v55 = vmul.f32 -1.442695, %v508_v54  ;;  %v670_v54 = vrot.slane %v653_v38, 5 }
 0x3ec   :  { %2802 = vtanh.f32 %v3442_v47 }
 0x3ed   :  { %2804 = vrcp.f32 %v376_v57 }
 0x3ee   :  { %2806 = vpow2.f32 %v2255_v55  ;;  %v672_v55 = vrot.slane %v654_v39, 4 }
 0x3f6   :  { %v2803_v49 = vpop.eup %2802 }
 0x3f7   :  { %v2805_v50 = vpop.eup %2804  ;;  %527 = vrot.lane.b32.xlu1 %v2803_v49, %s3055_s1  ;;  %v386_v56 = vpop.permute.xlu0 %385  ;;  %v666_v49 = vrot.slane %v651_v34, 7 }
 0x3f8   :  { %v388_v1 = vmul.f32 %v2805_v50, %v386_v56  ;;  %v2807_v58 = vpop.eup %2806  ;;  %v383_v11 = vmul.f32 0.0, %v2805_v50  ;;  %v668_v50 = vrot.slane %v652_v33, 6 }
 0x3f9   :  { %v518_v61 = vadd.f32 1.0, %v2807_v58  ;;  %v667_v58 = vsel %vm156_vm1, %v666_v49, %v650_v32 }
 0x3fa   :  { %390 = vrot.lane.b32.xlu0 %v388_v1, %s3055_s1  ;;  %v657_v1 = vld [vmem:[%s4029_s0 + $0x3a] sm:$0x1] }
 0x3fb   :  { %2808 = vrcp.f32 %v518_v61  ;;  %v674_v61 = vrot.slane %v655_v41, 3 }
 0x405   :  { %v2809_v3 = vpop.eup %2808 }
 0x406   :  { %v525_v62 = vmul.f32 %v2809_v3, %v3341_v63 }
 0x469   :  { %v528_v5 = vpop.permute.xlu1 %527 }
 0x46a   :  { %v530_v7 = vmul.f32 %v2809_v3, %v528_v5  ;;  %v669_v3 = vsel %vm159_vm2, %v668_v50, %v667_v58  ;;  %v676_v5 = vrot.slane %v656_v46, 2 }
 0x46c   :  { %532 = vrot.lane.b32.xlu1 %v530_v7, %s3055_s1  ;;  %v391_v10 = vpop.permute.xlu0 %390  ;;  %v671_v7 = vsel %vm162_vm3, %v670_v54, %v669_v3 }
 0x46d   :  { %v3449_v13 = vadd.f32 %v391_v10, %v383_v11  ;;  %v678_v11 = vrot.slane %v657_v1, 1  ;;  %v673_v10 = vsel %vm165_vm4, %v672_v55, %v671_v7 }
 0x46f   :  { %2810 = vtanh.f32 %v3449_v13 }
 0x470   :  { %2812 = vpow2.f32 %v2251_v19 }
 0x479   :  { %v2811_v16 = vpop.eup %2810 }
 0x47a   :  { %396 = vrot.lane.b32.xlu0 %v2811_v16, %s3055_s1  ;;  %v2813_v21 = vpop.eup %2812  ;;  %v675_v16 = vsel %vm168_vm5, %v674_v61, %v673_v10 }
 0x47b   :  { %v377_v25 = vadd.f32 1.0, %v2813_v21  ;;  %v677_v19 = vsel %vm171_vm6, %v676_v5, %v675_v16 }
 0x47c   :  { %v679_v21 = vsel %vm174_vm9, %v678_v11, %v677_v19 }
 0x47d   :  { %681 = vst.msk [vmem:[#allocation2] sm:$0xff] %vm177_vm10, %v679_v21 }
 0x4de   :  { %v533_v26 = vpop.permute.xlu1 %532 }
 0x4df   :  { %v3454_v29 = vadd.f32 %v533_v26, %v525_v62  ;;  %v2256_v62 = vmul.f32 -1.442695, %v3442_v47 }
 0x4e1   :  { %2814 = vtanh.f32 %v3454_v29 }
 0x4e2   :  { %2816 = vrcp.f32 %v377_v25 }
 0x4e3   :  { %2818 = vpow2.f32 %v2256_v62 }
 0x4eb   :  { %v2815_v63 = vpop.eup %2814 }
 0x4ec   :  { %v2817_v42 = vpop.eup %2816  ;;  %538 = vrot.lane.b32.xlu1 %v2815_v63, %s3055_s1  ;;  %v397_v57 = vpop.permute.xlu0 %396 }
 0x4ed   :  { %v399_v56 = vmul.f32 %v2817_v42, %v397_v57  ;;  %v2819_v25 = vpop.eup %2818 }
 0x4ee   :  { %v519_v26 = vadd.f32 1.0, %v2819_v25 }
 0x4ef   :  { %544 = vrot.lane.b32.xlu0 %v399_v56, %s3055_s1 }
 0x4f0   :  { %2820 = vrcp.f32 %v519_v26 }
 0x4fa   :  { %v2821_v32 = vpop.eup %2820 }
 0x55e   :  { %v539_v34 = vpop.permute.xlu1 %538 }
 0x55f   :  { %v541_v33 = vmul.f32 %v2821_v32, %v539_v34 }
 0x561   :  { %542 = vst.msk [vmem:[#allocation3] sm:$0xff] %vm294_vm13, %v541_v33  ;;  %683 = vrot.lane.b32.xlu1 %v541_v33, %s3056_s9  ;;  %v545_v63 = vpop.permute.xlu0 %544 }
 0x562   :  { %547 = vst.msk [vmem:[#allocation3] sm:$0xff] %vm296_vm14, %v545_v63 }
 0x569   :  { %v548_v38 = vld [vmem:[#allocation3] sm:$0xff] }
 0x56a   :  { %614 = vmatmul.mubr.f32.vlgmr.msra.gmra.mrb[2].mxu1 %v548_v38 }
 0x56b   :  { %2496 = vmatpush1.bf16.msra.mxu1 %v3157_v8  ;;  %1005 = vmatprep.mubr.f32.mxu1 %v3053_v0 }
 0x56c   :  { %2498 = vmatprep.subr.bf16.mxu1 %v3159_v9 }
 0x56f   :  { %2500 = vmatpush1.bf16.msra.mxu1 %v3175_v14 }
 0x570   :  { %2502 = vmatprep.subr.bf16.mxu1 %v3178_v15 }
 0x573   :  { %2504 = vmatpush1.bf16.msra.mxu1 %v3205_v24 }
 0x574   :  { %2506 = vmatprep.subr.bf16.mxu1 %v3217_v28 }
 0x577   :  { %2508 = vmatpush1.bf16.msra.mxu1 %v3236_v40 }
 0x578   :  { %2511 = vmatprep.subr.msk.bf16.mxu1 %vm3250_vm8, %v3240_v43 }
 0x57b   :  { %2514 = vmatpush1.bf16.msk.msra.mxu1 %vm3250_vm8, %v3257_v51 }
 0x57c   :  { %2516 = vmatprep.subr.bf16.mxu1 %v3306_v18 }
 0x5d3   :  { %v684_v47 = vpop.permute.xlu1 %683 }
 0x5d4   :  { %686 = vst.msk [vmem:[#allocation2] sm:$0xff] %vm179_vm11, %v684_v47 }
 0x5db   :  { %v687_v39 = vld [vmem:[#allocation2] sm:$0xff] }
 0x5dc   :  { %2261 = vmatmul.mubr.msk.f32.vlgmr.msra.gmra.mrb[4].mxu0 %vm182_vm12, %v687_v39 }
 0x5dd   :  { %2464 = vmatpush1.bf16.msra.mxu0 %v3308_v22  ;;  %863 = vmatprep.mubr.f32.mxu0 %v3053_v0 }
 0x5de   :  { %2466 = vmatprep.subr.bf16.mxu0 %v3310_v23 }
 0x5e1   :  { %2468 = vmatpush1.bf16.msra.mxu0 %v3314_v30 }
 0x5e2   :  { %2470 = vmatprep.subr.bf16.mxu0 %v3317_v31 }
 0x5e5   :  { %2472 = vmatpush1.bf16.msra.mxu0 %v3320_v36 }
 0x5e6   :  { %2474 = vmatprep.subr.bf16.mxu0 %v3323_v37 }
 0x5e9   :  { %2476 = vmatpush1.bf16.msra.mxu0 %v3326_v44 }
 0x5ea   :  { %2478 = vmatprep.subr.bf16.mxu0 %v3329_v45 }
 0x5ed   :  { %2480 = vmatpush1.bf16.msra.mxu0 %v3332_v52 }
 0x5ee   :  { %2482 = vmatprep.subr.bf16.mxu0 %v3335_v53 }
 0x5f1   :  { %2484 = vmatpush1.bf16.msra.mxu0 %v3339_v60 }
 0x5f2   :  { %2486 = vmatprep.subr.bf16.mxu0 %v3344_v6 }
 0x5f5   :  { %2488 = vmatpush1.bf16.msra.mxu0 %v3347_v12 }
 0x5f6   :  { %2490 = vmatprep.subr.bf16.mxu0 %v3351_v17 }
 0x5f9   :  { %2492 = vmatpush1.bf16.msra.mxu0 %v3353_v20 }
 0x5fa   :  { %2548 = vmatprep.subr.bf16.mxu0 %v3146_v4 }
 0x63d   :  { %v615_v41 = vpop.f32.mrb[2].mxu1 }
 0x63e   :  { %v617_v42 = vpop.f32.mrb[3].mxu1  ;;  %v616_v49 = vadd.f32 %v615_v41, %v3438_v35 }
 0x63f   :  { %v618_v57 = vadd.f32 %v617_v42, %v3432_v27 }
 0x640   :  { %v2257_v50 = vmul.f32 -1.442695, %v616_v49  ;;  %v903_v49 = vld [vmem:[%s4029_s0 + $0x1b] sm:$0x1] }
 0x641   :  { %2822 = vtanh.f32 %v618_v57  ;;  %v2258_v63 = vmul.f32 -1.442695, %v618_v57  ;;  %v902_v57 = vld [vmem:[%s4029_s0 + $0x13] sm:$0x1] }
 0x642   :  { %2824 = vpow2.f32 %v2257_v50  ;;  %v904_v50 = vld [vmem:[%s4029_s0 + $0x23] sm:$0x1] }
 0x64b   :  { %v2823_v46 = vpop.eup %2822 }
 0x64c   :  { %635 = vrot.lane.b32.xlu0 %v2823_v46, %s3055_s1  ;;  %v2825_v56 = vpop.eup %2824  ;;  %v901_v46 = vld [vmem:[%s4029_s0 + $0xb] sm:$0x1] }
 0x64d   :  { %v626_v54 = vadd.f32 1.0, %v2825_v56  ;;  %v905_v56 = vld [vmem:[%s4029_s0 + $0x2b] sm:$0x1] }
 0x6af   :  { %v757_v1 = vpop.f32.mrb[4].mxu0 }
 0x6b0   :  { %v759_v55 = vpop.f32.mrb[5].mxu0  ;;  %v758_v11 = vadd.f32 %v757_v1, %v3302_v2 }
 0x6b1   :  { %v3533_v58 = vadd.f32 %v759_v55, %v3292_v59  ;;  %v906_v55 = vld [vmem:[%s4029_s0 + $0x33] sm:$0x1] }
 0x6b2   :  { %v2262_v10 = vmul.f32 -1.442695, %v758_v11  ;;  %v920_v11 = vrot.slane %v903_v49, 5 }
 0x6b3   :  { %2826 = vtanh.f32 %v3533_v58 }
 0x6b4   :  { %2828 = vrcp.f32 %v626_v54 }
 0x6b5   :  { %2830 = vpow2.f32 %v2262_v10  ;;  %v922_v10 = vrot.slane %v904_v50, 4 }
 0x6bd   :  { %v2827_v61 = vpop.eup %2826 }
 0x6be   :  { %v2829_v3 = vpop.eup %2828  ;;  %777 = vrot.lane.b32.xlu1 %v2827_v61, %s3055_s1  ;;  %v636_v5 = vpop.permute.xlu0 %635  ;;  %v916_v61 = vrot.slane %v901_v46, 7 }
 0x6bf   :  { %v638_v7 = vmul.f32 %v2829_v3, %v636_v5  ;;  %v2831_v16 = vpop.eup %2830  ;;  %v633_v26 = vmul.f32 %v2829_v3, %v3449_v13  ;;  %v900_v13 = vld [vmem:[%s4029_s0 + $0x3] sm:$0x1]  ;;  %v918_v3 = vrot.slane %v902_v57, 6 }
 0x6c0   :  { %v768_v19 = vadd.f32 1.0, %v2831_v16  ;;  %v917_v16 = vsel %vm156_vm1, %v916_v61, %v900_v13 }
 0x6c1   :  { %640 = vrot.lane.b32.xlu0 %v638_v7, %s3055_s1  ;;  %v907_v7 = vld [vmem:[%s4029_s0 + $0x3b] sm:$0x1] }
 0x6c2   :  { %2832 = vrcp.f32 %v768_v19  ;;  %v924_v19 = vrot.slane %v905_v56, 3 }
 0x6cc   :  { %v2833_v21 = vpop.eup %2832 }
 0x6cd   :  { %v775_v47 = vmul.f32 %v2833_v21, %v3454_v29 }
 0x730   :  { %v778_v62 = vpop.permute.xlu1 %777 }
 0x731   :  { %v780_v25 = vmul.f32 %v2833_v21, %v778_v62  ;;  %v919_v21 = vsel %vm159_vm2, %v918_v3, %v917_v16  ;;  %v926_v62 = vrot.slane %v906_v55, 2 }
 0x733   :  { %782 = vrot.lane.b32.xlu1 %v780_v25, %s3055_s1  ;;  %v641_v32 = vpop.permute.xlu0 %640  ;;  %v921_v25 = vsel %vm162_vm3, %v920_v11, %v919_v21 }
 0x734   :  { %v3541_v34 = vadd.f32 %v641_v32, %v633_v26  ;;  %v928_v26 = vrot.slane %v907_v7, 1  ;;  %v923_v32 = vsel %vm165_vm4, %v922_v10, %v921_v25 }
 0x736   :  { %2834 = vtanh.f32 %v3541_v34 }
 0x737   :  { %2836 = vpow2.f32 %v2258_v63 }
 0x740   :  { %v2835_v33 = vpop.eup %2834 }
 0x741   :  { %646 = vrot.lane.b32.xlu0 %v2835_v33, %s3055_s1  ;;  %v2837_v38 = vpop.eup %2836  ;;  %v925_v33 = vsel %vm168_vm5, %v924_v19, %v923_v32 }
 0x742   :  { %v627_v39 = vadd.f32 1.0, %v2837_v38  ;;  %v927_v63 = vsel %vm171_vm6, %v926_v62, %v925_v33 }
 0x743   :  { %v929_v38 = vsel %vm174_vm9, %v928_v26, %v927_v63 }
 0x744   :  { %931 = vst.msk [vmem:[#allocation2] sm:$0xff] %vm177_vm10, %v929_v38 }
 0x7a5   :  { %v783_v41 = vpop.permute.xlu1 %782 }
 0x7a6   :  { %v3546_v42 = vadd.f32 %v783_v41, %v775_v47  ;;  %v2263_v47 = vmul.f32 -1.442695, %v3533_v58 }
 0x7a8   :  { %2838 = vtanh.f32 %v3546_v42 }
 0x7a9   :  { %2840 = vrcp.f32 %v627_v39 }
 0x7aa   :  { %2842 = vpow2.f32 %v2263_v47 }
 0x7b2   :  { %v2839_v29 = vpop.eup %2838 }
 0x7b3   :  { %v2841_v1 = vpop.eup %2840  ;;  %788 = vrot.lane.b32.xlu1 %v2839_v29, %s3055_s1  ;;  %v647_v54 = vpop.permute.xlu0 %646 }
 0x7b4   :  { %v649_v5 = vmul.f32 %v2841_v1, %v647_v54  ;;  %v2843_v39 = vpop.eup %2842 }
 0x7b5   :  { %v769_v41 = vadd.f32 1.0, %v2843_v39 }
 0x7b6   :  { %794 = vrot.lane.b32.xlu0 %v649_v5, %s3055_s1 }
 0x7b7   :  { %2844 = vrcp.f32 %v769_v41 }
 0x7c1   :  { %v2845_v13 = vpop.eup %2844 }
 0x825   :  { %v789_v46 = vpop.permute.xlu1 %788 }
 0x826   :  { %v791_v57 = vmul.f32 %v2845_v13, %v789_v46 }
 0x828   :  { %792 = vst.msk [vmem:[#allocation3] sm:$0xff] %vm294_vm13, %v791_v57  ;;  %933 = vrot.lane.b32.xlu1 %v791_v57, %s3056_s9  ;;  %v795_v29 = vpop.permute.xlu0 %794 }
 0x829   :  { %797 = vst.msk [vmem:[#allocation3] sm:$0xff] %vm296_vm14, %v795_v29 }
 0x830   :  { %v798_v49 = vld [vmem:[#allocation3] sm:$0xff] }
 0x831   :  { %864 = vmatmul.mubr.f32.vlgmr.msra.gmra.mrb[6].mxu0 %v798_v49 }
 0x832   :  { %2550 = vmatpush1.bf16.msra.mxu0 %v3157_v8  ;;  %1255 = vmatprep.mubr.f32.mxu0 %v3053_v0 }
 0x833   :  { %2552 = vmatprep.subr.bf16.mxu0 %v3159_v9 }
 0x836   :  { %2554 = vmatpush1.bf16.msra.mxu0 %v3175_v14 }
 0x837   :  { %2556 = vmatprep.subr.bf16.mxu0 %v3178_v15 }
 0x83a   :  { %2558 = vmatpush1.bf16.msra.mxu0 %v3205_v24 }
 0x83b   :  { %2560 = vmatprep.subr.bf16.mxu0 %v3217_v28 }
 0x83e   :  { %2562 = vmatpush1.bf16.msra.mxu0 %v3236_v40 }
 0x83f   :  { %2565 = vmatprep.subr.msk.bf16.mxu0 %vm3250_vm8, %v3240_v43 }
 0x842   :  { %2568 = vmatpush1.bf16.msk.msra.mxu0 %vm3250_vm8, %v3257_v51 }
 0x843   :  { %2570 = vmatprep.subr.bf16.mxu0 %v3306_v18 }
 0x89a   :  { %v934_v58 = vpop.permute.xlu1 %933 }
 0x89b   :  { %936 = vst.msk [vmem:[#allocation2] sm:$0xff] %vm179_vm11, %v934_v58 }
 0x8a2   :  { %v937_v50 = vld [vmem:[#allocation2] sm:$0xff] }
 0x8a3   :  { %2268 = vmatmul.mubr.msk.f32.vlgmr.msra.gmra.mrb[4].mxu1 %vm182_vm12, %v937_v50 }
 0x8a4   :  { %2518 = vmatpush1.bf16.msra.mxu1 %v3308_v22  ;;  %1113 = vmatprep.mubr.f32.mxu1 %v3053_v0 }
 0x8a5   :  { %2520 = vmatprep.subr.bf16.mxu1 %v3310_v23 }
 0x8a8   :  { %2522 = vmatpush1.bf16.msra.mxu1 %v3314_v30 }
 0x8a9   :  { %2524 = vmatprep.subr.bf16.mxu1 %v3317_v31 }
 0x8ac   :  { %2526 = vmatpush1.bf16.msra.mxu1 %v3320_v36 }
 0x8ad   :  { %2528 = vmatprep.subr.bf16.mxu1 %v3323_v37 }
 0x8b0   :  { %2530 = vmatpush1.bf16.msra.mxu1 %v3326_v44 }
 0x8b1   :  { %2532 = vmatprep.subr.bf16.mxu1 %v3329_v45 }
 0x8b4   :  { %2534 = vmatpush1.bf16.msra.mxu1 %v3332_v52 }
 0x8b5   :  { %2536 = vmatprep.subr.bf16.mxu1 %v3335_v53 }
 0x8b8   :  { %2538 = vmatpush1.bf16.msra.mxu1 %v3339_v60 }
 0x8b9   :  { %2540 = vmatprep.subr.bf16.mxu1 %v3344_v6 }
 0x8bc   :  { %2542 = vmatpush1.bf16.msra.mxu1 %v3347_v12 }
 0x8bd   :  { %2544 = vmatprep.subr.bf16.mxu1 %v3351_v17 }
 0x8c0   :  { %2546 = vmatpush1.bf16.msra.mxu1 %v3353_v20 }
 0x8c1   :  { %2602 = vmatprep.subr.bf16.mxu1 %v3146_v4 }
 0x904   :  { %v865_v56 = vpop.f32.mrb[6].mxu0 }
 0x905   :  { %v867_v1 = vpop.f32.mrb[7].mxu0  ;;  %v866_v61 = vadd.f32 %v865_v56, %v3438_v35 }
 0x906   :  { %v868_v54 = vadd.f32 %v867_v1, %v3432_v27 }
 0x907   :  { %v2264_v3 = vmul.f32 -1.442695, %v866_v61  ;;  %v1153_v61 = vld [vmem:[%s4029_s0 + $0x1c] sm:$0x1] }
 0x908   :  { %2846 = vtanh.f32 %v868_v54  ;;  %v2265_v29 = vmul.f32 -1.442695, %v868_v54  ;;  %v1152_v54 = vld [vmem:[%s4029_s0 + $0x14] sm:$0x1] }
 0x909   :  { %2848 = vpow2.f32 %v2264_v3  ;;  %v1154_v3 = vld [vmem:[%s4029_s0 + $0x24] sm:$0x1] }
 0x912   :  { %v2847_v55 = vpop.eup %2846 }
 0x913   :  { %885 = vrot.lane.b32.xlu0 %v2847_v55, %s3055_s1  ;;  %v2849_v5 = vpop.eup %2848  ;;  %v1151_v55 = vld [vmem:[%s4029_s0 + $0xc] sm:$0x1] }
 0x914   :  { %v876_v11 = vadd.f32 1.0, %v2849_v5  ;;  %v1155_v5 = vld [vmem:[%s4029_s0 + $0x2c] sm:$0x1] }
 0x976   :  { %v1007_v7 = vpop.f32.mrb[4].mxu1 }
 0x977   :  { %v1009_v10 = vpop.f32.mrb[5].mxu1  ;;  %v1008_v26 = vadd.f32 %v1007_v7, %v3302_v2 }
 0x978   :  { %v3625_v16 = vadd.f32 %v1009_v10, %v3292_v59  ;;  %v1156_v10 = vld [vmem:[%s4029_s0 + $0x34] sm:$0x1] }
 0x979   :  { %v2269_v32 = vmul.f32 -1.442695, %v1008_v26  ;;  %v1170_v26 = vrot.slane %v1153_v61, 5 }
 0x97a   :  { %2850 = vtanh.f32 %v3625_v16 }
 0x97b   :  { %2852 = vrcp.f32 %v876_v11 }
 0x97c   :  { %2854 = vpow2.f32 %v2269_v32  ;;  %v1172_v32 = vrot.slane %v1154_v3, 4 }
 0x984   :  { %v2851_v19 = vpop.eup %2850 }
 0x985   :  { %v2853_v21 = vpop.eup %2852  ;;  %1027 = vrot.lane.b32.xlu1 %v2851_v19, %s3055_s1  ;;  %v886_v62 = vpop.permute.xlu0 %885  ;;  %v1166_v19 = vrot.slane %v1151_v55, 7 }
 0x986   :  { %v888_v25 = vmul.f32 %v2853_v21, %v886_v62  ;;  %v2855_v33 = vpop.eup %2854  ;;  %v883_v41 = vmul.f32 %v2853_v21, %v3541_v34  ;;  %v1150_v34 = vld [vmem:[%s4029_s0 + $0x4] sm:$0x1]  ;;  %v1168_v21 = vrot.slane %v1152_v54, 6 }
 0x987   :  { %v1018_v63 = vadd.f32 1.0, %v2855_v33  ;;  %v1167_v33 = vsel %vm156_vm1, %v1166_v19, %v1150_v34 }
 0x988   :  { %890 = vrot.lane.b32.xlu0 %v888_v25, %s3055_s1  ;;  %v1157_v25 = vld [vmem:[%s4029_s0 + $0x3c] sm:$0x1] }
 0x989   :  { %2856 = vrcp.f32 %v1018_v63  ;;  %v1174_v63 = vrot.slane %v1155_v5, 3 }
 0x993   :  { %v2857_v38 = vpop.eup %2856 }
 0x994   :  { %v1025_v58 = vmul.f32 %v2857_v38, %v3546_v42 }
 0x9f7   :  { %v1028_v47 = vpop.permute.xlu1 %1027 }
 0x9f8   :  { %v1030_v39 = vmul.f32 %v2857_v38, %v1028_v47  ;;  %v1169_v38 = vsel %vm159_vm2, %v1168_v21, %v1167_v33  ;;  %v1176_v47 = vrot.slane %v1156_v10, 2 }
 0x9fa   :  { %1032 = vrot.lane.b32.xlu1 %v1030_v39, %s3055_s1  ;;  %v891_v13 = vpop.permute.xlu0 %890  ;;  %v1171_v39 = vsel %vm162_vm3, %v1170_v26, %v1169_v38 }
 0x9fb   :  { %v3633_v46 = vadd.f32 %v891_v13, %v883_v41  ;;  %v1178_v41 = vrot.slane %v1157_v25, 1  ;;  %v1173_v13 = vsel %vm165_vm4, %v1172_v32, %v1171_v39 }
 0x9fd   :  { %2858 = vtanh.f32 %v3633_v46 }
 0x9fe   :  { %2860 = vpow2.f32 %v2265_v29 }
 0xa07   :  { %v2859_v57 = vpop.eup %2858 }
 0xa08   :  { %896 = vrot.lane.b32.xlu0 %v2859_v57, %s3055_s1  ;;  %v2861_v49 = vpop.eup %2860  ;;  %v1175_v57 = vsel %vm168_vm5, %v1174_v63, %v1173_v13 }
 0xa09   :  { %v877_v50 = vadd.f32 1.0, %v2861_v49  ;;  %v1177_v29 = vsel %vm171_vm6, %v1176_v47, %v1175_v57 }
 0xa0a   :  { %v1179_v49 = vsel %vm174_vm9, %v1178_v41, %v1177_v29 }
 0xa0b   :  { %1181 = vst.msk [vmem:[#allocation2] sm:$0xff] %vm177_vm10, %v1179_v49 }
 0xa6c   :  { %v1033_v56 = vpop.permute.xlu1 %1032 }
 0xa6d   :  { %v3638_v1 = vadd.f32 %v1033_v56, %v1025_v58  ;;  %v2270_v58 = vmul.f32 -1.442695, %v3625_v16 }
 0xa6f   :  { %2862 = vtanh.f32 %v3638_v1 }
 0xa70   :  { %2864 = vrcp.f32 %v877_v50 }
 0xa71   :  { %2866 = vpow2.f32 %v2270_v58 }
 0xa79   :  { %v2863_v42 = vpop.eup %2862 }
 0xa7a   :  { %v2865_v7 = vpop.eup %2864  ;;  %1038 = vrot.lane.b32.xlu1 %v2863_v42, %s3055_s1  ;;  %v897_v11 = vpop.permute.xlu0 %896 }
 0xa7b   :  { %v899_v62 = vmul.f32 %v2865_v7, %v897_v11  ;;  %v2867_v50 = vpop.eup %2866 }
 0xa7c   :  { %v1019_v56 = vadd.f32 1.0, %v2867_v50 }
 0xa7d   :  { %1044 = vrot.lane.b32.xlu0 %v899_v62, %s3055_s1 }
 0xa7e   :  { %2868 = vrcp.f32 %v1019_v56 }
 0xa88   :  { %v2869_v34 = vpop.eup %2868 }
 0xaec   :  { %v1039_v55 = vpop.permute.xlu1 %1038 }
 0xaed   :  { %v1041_v54 = vmul.f32 %v2869_v34, %v1039_v55 }
 0xaef   :  { %1042 = vst.msk [vmem:[#allocation3] sm:$0xff] %vm294_vm13, %v1041_v54  ;;  %1183 = vrot.lane.b32.xlu1 %v1041_v54, %s3056_s9  ;;  %v1045_v42 = vpop.permute.xlu0 %1044 }
 0xaf0   :  { %1047 = vst.msk [vmem:[#allocation3] sm:$0xff] %vm296_vm14, %v1045_v42 }
 0xaf7   :  { %v1048_v61 = vld [vmem:[#allocation3] sm:$0xff] }
 0xaf8   :  { %1114 = vmatmul.mubr.f32.vlgmr.msra.gmra.mrb[6].mxu1 %v1048_v61 }
 0xaf9   :  { %2604 = vmatpush1.bf16.msra.mxu1 %v3157_v8  ;;  %1505 = vmatprep.mubr.f32.mxu1 %v3053_v0 }
 0xafa   :  { %2606 = vmatprep.subr.bf16.mxu1 %v3159_v9 }
 0xafd   :  { %2608 = vmatpush1.bf16.msra.mxu1 %v3175_v14 }
 0xafe   :  { %2610 = vmatprep.subr.bf16.mxu1 %v3178_v15 }
 0xb01   :  { %2612 = vmatpush1.bf16.msra.mxu1 %v3205_v24 }
 0xb02   :  { %2614 = vmatprep.subr.bf16.mxu1 %v3217_v28 }
 0xb05   :  { %2616 = vmatpush1.bf16.msra.mxu1 %v3236_v40 }
 0xb06   :  { %2619 = vmatprep.subr.msk.bf16.mxu1 %vm3250_vm8, %v3240_v43 }
 0xb09   :  { %2622 = vmatpush1.bf16.msk.msra.mxu1 %vm3250_vm8, %v3257_v51 }
 0xb0a   :  { %2624 = vmatprep.subr.bf16.mxu1 %v3306_v18 }
 0xb61   :  { %v1184_v16 = vpop.permute.xlu1 %1183 }
 0xb62   :  { %1186 = vst.msk [vmem:[#allocation2] sm:$0xff] %vm179_vm11, %v1184_v16 }
 0xb69   :  { %v1187_v3 = vld [vmem:[#allocation2] sm:$0xff] }
 0xb6a   :  { %2275 = vmatmul.mubr.msk.f32.vlgmr.msra.gmra.mrb[8].mxu0 %vm182_vm12, %v1187_v3 }
 0xb6b   :  { %2572 = vmatpush1.bf16.msra.mxu0 %v3308_v22  ;;  %1363 = vmatprep.mubr.f32.mxu0 %v3053_v0 }
 0xb6c   :  { %2574 = vmatprep.subr.bf16.mxu0 %v3310_v23 }
 0xb6f   :  { %2576 = vmatpush1.bf16.msra.mxu0 %v3314_v30 }
 0xb70   :  { %2578 = vmatprep.subr.bf16.mxu0 %v3317_v31 }
 0xb73   :  { %2580 = vmatpush1.bf16.msra.mxu0 %v3320_v36 }
 0xb74   :  { %2582 = vmatprep.subr.bf16.mxu0 %v3323_v37 }
 0xb77   :  { %2584 = vmatpush1.bf16.msra.mxu0 %v3326_v44 }
 0xb78   :  { %2586 = vmatprep.subr.bf16.mxu0 %v3329_v45 }
 0xb7b   :  { %2588 = vmatpush1.bf16.msra.mxu0 %v3332_v52 }
 0xb7c   :  { %2590 = vmatprep.subr.bf16.mxu0 %v3335_v53 }
 0xb7f   :  { %2592 = vmatpush1.bf16.msra.mxu0 %v3339_v60 }
 0xb80   :  { %2594 = vmatprep.subr.bf16.mxu0 %v3344_v6 }
 0xb83   :  { %2596 = vmatpush1.bf16.msra.mxu0 %v3347_v12 }
 0xb84   :  { %2598 = vmatprep.subr.bf16.mxu0 %v3351_v17 }
 0xb87   :  { %2600 = vmatpush1.bf16.msra.mxu0 %v3353_v20 }
 0xb88   :  { %2656 = vmatprep.subr.bf16.mxu0 %v3146_v4 }
 0xbcb   :  { %v1115_v5 = vpop.f32.mrb[6].mxu1 }
 0xbcc   :  { %v1117_v7 = vpop.f32.mrb[7].mxu1  ;;  %v1116_v19 = vadd.f32 %v1115_v5, %v3438_v35 }
 0xbcd   :  { %v1118_v11 = vadd.f32 %v1117_v7, %v3432_v27 }
 0xbce   :  { %v2271_v21 = vmul.f32 -1.442695, %v1116_v19  ;;  %v1403_v19 = vld [vmem:[%s4029_s0 + $0x1d] sm:$0x1] }
 0xbcf   :  { %2870 = vtanh.f32 %v1118_v11  ;;  %v2272_v42 = vmul.f32 -1.442695, %v1118_v11  ;;  %v1402_v11 = vld [vmem:[%s4029_s0 + $0x15] sm:$0x1] }
 0xbd0   :  { %2872 = vpow2.f32 %v2271_v21  ;;  %v1404_v21 = vld [vmem:[%s4029_s0 + $0x25] sm:$0x1] }
 0xbd9   :  { %v2871_v10 = vpop.eup %2870 }
 0xbda   :  { %1135 = vrot.lane.b32.xlu0 %v2871_v10, %s3055_s1  ;;  %v2873_v62 = vpop.eup %2872  ;;  %v1401_v10 = vld [vmem:[%s4029_s0 + $0xd] sm:$0x1] }
 0xbdb   :  { %v1126_v26 = vadd.f32 1.0, %v2873_v62  ;;  %v1405_v62 = vld [vmem:[%s4029_s0 + $0x2d] sm:$0x1] }
 0xc3d   :  { %v1257_v25 = vpop.f32.mrb[8].mxu0 }
 0xc3e   :  { %v1259_v32 = vpop.f32.mrb[9].mxu0  ;;  %v1258_v41 = vadd.f32 %v1257_v25, %v3302_v2 }
 0xc3f   :  { %v3717_v33 = vadd.f32 %v1259_v32, %v3292_v59  ;;  %v1406_v32 = vld [vmem:[%s4029_s0 + $0x35] sm:$0x1] }
 0xc40   :  { %v2276_v13 = vmul.f32 -1.442695, %v1258_v41  ;;  %v1420_v41 = vrot.slane %v1403_v19, 5 }
 0xc41   :  { %2874 = vtanh.f32 %v3717_v33 }
 0xc42   :  { %2876 = vrcp.f32 %v1126_v26 }
 0xc43   :  { %2878 = vpow2.f32 %v2276_v13  ;;  %v1422_v13 = vrot.slane %v1404_v21, 4 }
 0xc4b   :  { %v2875_v63 = vpop.eup %2874 }
 0xc4c   :  { %v2877_v38 = vpop.eup %2876  ;;  %1277 = vrot.lane.b32.xlu1 %v2875_v63, %s3055_s1  ;;  %v1136_v47 = vpop.permute.xlu0 %1135  ;;  %v1416_v63 = vrot.slane %v1401_v10, 7 }
 0xc4d   :  { %v1138_v39 = vmul.f32 %v2877_v38, %v1136_v47  ;;  %v2879_v57 = vpop.eup %2878  ;;  %v1133_v56 = vmul.f32 %v2877_v38, %v3633_v46  ;;  %v1400_v46 = vld [vmem:[%s4029_s0 + $0x5] sm:$0x1]  ;;  %v1418_v38 = vrot.slane %v1402_v11, 6 }
 0xc4e   :  { %v1268_v29 = vadd.f32 1.0, %v2879_v57  ;;  %v1417_v57 = vsel %vm156_vm1, %v1416_v63, %v1400_v46 }
 0xc4f   :  { %1140 = vrot.lane.b32.xlu0 %v1138_v39, %s3055_s1  ;;  %v1407_v39 = vld [vmem:[%s4029_s0 + $0x3d] sm:$0x1] }
 0xc50   :  { %2880 = vrcp.f32 %v1268_v29  ;;  %v1424_v29 = vrot.slane %v1405_v62, 3 }
 0xc5a   :  { %v2881_v49 = vpop.eup %2880 }
 0xc5b   :  { %v1275_v16 = vmul.f32 %v2881_v49, %v3638_v1 }
 0xcbe   :  { %v1278_v58 = vpop.permute.xlu1 %1277 }
 0xcbf   :  { %v1280_v50 = vmul.f32 %v2881_v49, %v1278_v58  ;;  %v1419_v49 = vsel %vm159_vm2, %v1418_v38, %v1417_v57  ;;  %v1426_v58 = vrot.slane %v1406_v32, 2 }
 0xcc1   :  { %1282 = vrot.lane.b32.xlu1 %v1280_v50, %s3055_s1  ;;  %v1141_v34 = vpop.permute.xlu0 %1140  ;;  %v1421_v50 = vsel %vm162_vm3, %v1420_v41, %v1419_v49 }
 0xcc2   :  { %v3725_v55 = vadd.f32 %v1141_v34, %v1133_v56  ;;  %v1428_v56 = vrot.slane %v1407_v39, 1  ;;  %v1423_v34 = vsel %vm165_vm4, %v1422_v13, %v1421_v50 }
 0xcc4   :  { %2882 = vtanh.f32 %v3725_v55 }
 0xcc5   :  { %2884 = vpow2.f32 %v2272_v42 }
 0xcce   :  { %v2883_v54 = vpop.eup %2882 }
 0xccf   :  { %1146 = vrot.lane.b32.xlu0 %v2883_v54, %s3055_s1  ;;  %v2885_v61 = vpop.eup %2884  ;;  %v1425_v54 = vsel %vm168_vm5, %v1424_v29, %v1423_v34 }
 0xcd0   :  { %v1127_v3 = vadd.f32 1.0, %v2885_v61  ;;  %v1427_v42 = vsel %vm171_vm6, %v1426_v58, %v1425_v54 }
 0xcd1   :  { %v1429_v61 = vsel %vm174_vm9, %v1428_v56, %v1427_v42 }
 0xcd2   :  { %1431 = vst.msk [vmem:[#allocation2] sm:$0xff] %vm177_vm10, %v1429_v61 }
 0xd33   :  { %v1283_v5 = vpop.permute.xlu1 %1282 }
 0xd34   :  { %v3730_v7 = vadd.f32 %v1283_v5, %v1275_v16  ;;  %v2277_v16 = vmul.f32 -1.442695, %v3717_v33 }
 0xd36   :  { %2886 = vtanh.f32 %v3730_v7 }
 0xd37   :  { %2888 = vrcp.f32 %v1127_v3 }
 0xd38   :  { %2890 = vpow2.f32 %v2277_v16 }
 0xd40   :  { %v2887_v1 = vpop.eup %2886 }
 0xd41   :  { %v2889_v25 = vpop.eup %2888  ;;  %1288 = vrot.lane.b32.xlu1 %v2887_v1, %s3055_s1  ;;  %v1147_v26 = vpop.permute.xlu0 %1146 }
 0xd42   :  { %v1149_v47 = vmul.f32 %v2889_v25, %v1147_v26  ;;  %v2891_v3 = vpop.eup %2890 }
 0xd43   :  { %v1269_v5 = vadd.f32 1.0, %v2891_v3 }
 0xd44   :  { %1294 = vrot.lane.b32.xlu0 %v1149_v47, %s3055_s1 }
 0xd45   :  { %2892 = vrcp.f32 %v1269_v5 }
 0xd4f   :  { %v2893_v46 = vpop.eup %2892 }
 0xdb3   :  { %v1289_v10 = vpop.permute.xlu1 %1288 }
 0xdb4   :  { %v1291_v11 = vmul.f32 %v2893_v46, %v1289_v10 }
 0xdb6   :  { %1292 = vst.msk [vmem:[#allocation3] sm:$0xff] %vm294_vm13, %v1291_v11  ;;  %1433 = vrot.lane.b32.xlu1 %v1291_v11, %s3056_s9  ;;  %v1295_v1 = vpop.permute.xlu0 %1294 }
 0xdb7   :  { %1297 = vst.msk [vmem:[#allocation3] sm:$0xff] %vm296_vm14, %v1295_v1 }
 0xdbe   :  { %v1298_v19 = vld [vmem:[#allocation3] sm:$0xff] }
 0xdbf   :  { %1364 = vmatmul.mubr.f32.vlgmr.msra.gmra.mrb[10].mxu0 %v1298_v19 }
 0xdc0   :  { %2658 = vmatpush1.bf16.msra.mxu0 %v3157_v8  ;;  %1755 = vmatprep.mubr.f32.mxu0 %v3053_v0 }
 0xdc1   :  { %2660 = vmatprep.subr.bf16.mxu0 %v3159_v9 }
 0xdc4   :  { %2662 = vmatpush1.bf16.msra.mxu0 %v3175_v14 }
 0xdc5   :  { %2664 = vmatprep.subr.bf16.mxu0 %v3178_v15 }
 0xdc8   :  { %2666 = vmatpush1.bf16.msra.mxu0 %v3205_v24 }
 0xdc9   :  { %2668 = vmatprep.subr.bf16.mxu0 %v3217_v28 }
 0xdcc   :  { %2670 = vmatpush1.bf16.msra.mxu0 %v3236_v40 }
 0xdcd   :  { %2673 = vmatprep.subr.msk.bf16.mxu0 %vm3250_vm8, %v3240_v43 }
 0xdd0   :  { %2676 = vmatpush1.bf16.msk.msra.mxu0 %vm3250_vm8, %v3257_v51 }
 0xdd1   :  { %2678 = vmatprep.subr.bf16.mxu0 %v3306_v18 }
 0xe28   :  { %v1434_v33 = vpop.permute.xlu1 %1433 }
 0xe29   :  { %1436 = vst.msk [vmem:[#allocation2] sm:$0xff] %vm179_vm11, %v1434_v33 }
 0xe30   :  { %v1437_v21 = vld [vmem:[#allocation2] sm:$0xff] }
 0xe31   :  { %2282 = vmatmul.mubr.msk.f32.vlgmr.msra.gmra.mrb[8].mxu1 %vm182_vm12, %v1437_v21 }
 0xe32   :  { %2626 = vmatpush1.bf16.msra.mxu1 %v3308_v22  ;;  %1613 = vmatprep.mubr.f32.mxu1 %v3053_v0 }
 0xe33   :  { %2628 = vmatprep.subr.bf16.mxu1 %v3310_v23 }
 0xe36   :  { %2630 = vmatpush1.bf16.msra.mxu1 %v3314_v30 }
 0xe37   :  { %2632 = vmatprep.subr.bf16.mxu1 %v3317_v31 }
 0xe3a   :  { %2634 = vmatpush1.bf16.msra.mxu1 %v3320_v36 }
 0xe3b   :  { %2636 = vmatprep.subr.bf16.mxu1 %v3323_v37 }
 0xe3e   :  { %2638 = vmatpush1.bf16.msra.mxu1 %v3326_v44 }
 0xe3f   :  { %2640 = vmatprep.subr.bf16.mxu1 %v3329_v45 }
 0xe42   :  { %2642 = vmatpush1.bf16.msra.mxu1 %v3332_v52 }
 0xe43   :  { %2644 = vmatprep.subr.bf16.mxu1 %v3335_v53 }
 0xe46   :  { %2646 = vmatpush1.bf16.msra.mxu1 %v3339_v60 }
 0xe47   :  { %2648 = vmatprep.subr.bf16.mxu1 %v3344_v6 }
 0xe4a   :  { %2650 = vmatpush1.bf16.msra.mxu1 %v3347_v12 }
 0xe4b   :  { %2652 = vmatprep.subr.bf16.mxu1 %v3351_v17 }
 0xe4e   :  { %2654 = vmatpush1.bf16.msra.mxu1 %v3353_v20 }
 0xe4f   :  { %2710 = vmatprep.subr.bf16.mxu1 %v3146_v4 }
 0xe92   :  { %v1365_v62 = vpop.f32.mrb[10].mxu0 }
 0xe93   :  { %v1367_v25 = vpop.f32.mrb[11].mxu0  ;;  %v1366_v63 = vadd.f32 %v1365_v62, %v3438_v35 }
 0xe94   :  { %v1368_v26 = vadd.f32 %v1367_v25, %v3432_v27  ;;  %v1651_v25 = vld [vmem:[%s4029_s0 + $0xe] sm:$0x1] }
 0xe95   :  { %v2278_v38 = vmul.f32 -1.442695, %v1366_v63  ;;  %v1654_v63 = vld [vmem:[%s4029_s0 + $0x26] sm:$0x1] }
 0xe96   :  { %2894 = vtanh.f32 %v1368_v26  ;;  %v2279_v11 = vmul.f32 -1.442695, %v1368_v26  ;;  %v1652_v26 = vld [vmem:[%s4029_s0 + $0x16] sm:$0x1] }
 0xe97   :  { %2896 = vpow2.f32 %v2278_v38  ;;  %v1655_v38 = vld [vmem:[%s4029_s0 + $0x2e] sm:$0x1] }
 0xea0   :  { %v2895_v32 = vpop.eup %2894 }
 0xea1   :  { %1385 = vrot.lane.b32.xlu0 %v2895_v32, %s3055_s1  ;;  %v2897_v47 = vpop.eup %2896  ;;  %v1653_v32 = vld [vmem:[%s4029_s0 + $0x1e] sm:$0x1] }
 0xea2   :  { %v1376_v41 = vadd.f32 1.0, %v2897_v47 }
 0xf04   :  { %v1507_v39 = vpop.f32.mrb[8].mxu1 }
 0xf05   :  { %v1509_v13 = vpop.f32.mrb[9].mxu1  ;;  %v1508_v50 = vadd.f32 %v1507_v39, %v3302_v2 }
 0xf06   :  { %v3809_v57 = vadd.f32 %v1509_v13, %v3292_v59  ;;  %v1666_v13 = vrot.slane %v1651_v25, 7 }
 0xf07   :  { %v2283_v56 = vmul.f32 -1.442695, %v1508_v50  ;;  %v1672_v50 = vrot.slane %v1654_v63, 4 }
 0xf08   :  { %2898 = vtanh.f32 %v3809_v57 }
 0xf09   :  { %2900 = vrcp.f32 %v1376_v41  ;;  %v1656_v41 = vld [vmem:[%s4029_s0 + $0x36] sm:$0x1] }
 0xf0a   :  { %2902 = vpow2.f32 %v2283_v56 }
 0xf12   :  { %v2899_v4 = vpop.eup %2898 }
 0xf13   :  { %v2901_v29 = vpop.eup %2900  ;;  %1527 = vrot.lane.b32.xlu1 %v2899_v4, %s3055_s1  ;;  %v1386_v49 = vpop.permute.xlu0 %1385  ;;  %v1668_v4 = vrot.slane %v1652_v26, 6 }
 0xf14   :  { %v1388_v58 = vmul.f32 %v2901_v29, %v1386_v49  ;;  %v2903_v34 = vpop.eup %2902  ;;  %v1383_v3 = vmul.f32 %v2901_v29, %v3725_v55  ;;  %v1650_v55 = vld [vmem:[%s4029_s0 + $0x6] sm:$0x1]  ;;  %v1657_v49 = vld [vmem:[%s4029_s0 + $0x3e] sm:$0x1] }
 0xf15   :  { %v1518_v54 = vadd.f32 1.0, %v2903_v34  ;;  %v1667_v56 = vsel %vm156_vm1, %v1666_v13, %v1650_v55  ;;  %v1674_v34 = vrot.slane %v1655_v38, 3 }
 0xf16   :  { %1390 = vrot.lane.b32.xlu0 %v1388_v58, %s3055_s1  ;;  %v1670_v58 = vrot.slane %v1653_v32, 5 }
 0xf17   :  { %2904 = vrcp.f32 %v1518_v54  ;;  %v1669_v54 = vsel %vm159_vm2, %v1668_v4, %v1667_v56 }
 0xf21   :  { %v2905_v42 = vpop.eup %2904 }
 0xf22   :  { %v1525_v19 = vmul.f32 %v2905_v42, %v3730_v7 }
 0xf85   :  { %v1528_v61 = vpop.permute.xlu1 %1527 }
 0xf86   :  { %v1530_v16 = vmul.f32 %v2905_v42, %v1528_v61  ;;  %v1676_v42 = vrot.slane %v1656_v41, 2  ;;  %v1671_v61 = vsel %vm162_vm3, %v1670_v58, %v1669_v54 }
 0xf88   :  { %1532 = vrot.lane.b32.xlu1 %v1530_v16, %s3055_s1  ;;  %v1391_v5 = vpop.permute.xlu0 %1390  ;;  %v1678_v16 = vrot.slane %v1657_v49, 1 }
 0xf89   :  { %v3817_v46 = vadd.f32 %v1391_v5, %v1383_v3  ;;  %v1673_v3 = vsel %vm165_vm4, %v1672_v50, %v1671_v61 }
 0xf8a   :  { %v1675_v5 = vsel %vm168_vm5, %v1674_v34, %v1673_v3 }
 0xf8b   :  { %2906 = vtanh.f32 %v3817_v46 }
 0xf8c   :  { %2908 = vpow2.f32 %v2279_v11 }
 0xf95   :  { %v2907_v10 = vpop.eup %2906 }
 0xf96   :  { %1396 = vrot.lane.b32.xlu0 %v2907_v10, %s3055_s1  ;;  %v2909_v1 = vpop.eup %2908  ;;  %v1677_v10 = vsel %vm171_vm6, %v1676_v42, %v1675_v5 }
 0xf97   :  { %v1377_v33 = vadd.f32 1.0, %v2909_v1  ;;  %v1679_v11 = vsel %vm174_vm9, %v1678_v16, %v1677_v10  ;;  %v2284_v1 = vmul.f32 -1.442695, %v3809_v57 }
 0xf98   :  { %1681 = vst.msk [vmem:[#allocation2] sm:$0xff] %vm177_vm10, %v1679_v11 }
 0xffa   :  { %v1533_v21 = vpop.permute.xlu1 %1532 }
 0xffb   :  { %v3822_v62 = vadd.f32 %v1533_v21, %v1525_v19 }
 0xffd   :  { %2910 = vtanh.f32 %v3822_v62 }
 0xffe   :  { %2912 = vrcp.f32 %v1377_v33 }
 0xfff   :  { %2914 = vpow2.f32 %v2284_v1  ;;  %v1901_v1 = vld [vmem:[%s4029_s0 + $0xf] sm:$0x1] }
0x1007   :  { %v2911_v7 = vpop.eup %2910 }
0x1008   :  { %v2913_v47 = vpop.eup %2912  ;;  %1538 = vrot.lane.b32.xlu1 %v2911_v7, %s3055_s1  ;;  %v1397_v39 = vpop.permute.xlu0 %1396 }
0x1009   :  { %v1399_v29 = vmul.f32 %v2913_v47, %v1397_v39  ;;  %v2915_v19 = vpop.eup %2914 }
0x100a   :  { %v1519_v33 = vadd.f32 1.0, %v2915_v19  ;;  %v1902_v19 = vld [vmem:[%s4029_s0 + $0x17] sm:$0x1] }
0x100b   :  { %1544 = vrot.lane.b32.xlu0 %v1399_v29, %s3055_s1 }
0x100c   :  { %2916 = vrcp.f32 %v1519_v33  ;;  %v1903_v33 = vld [vmem:[%s4029_s0 + $0x1f] sm:$0x1] }
0x1016   :  { %v2917_v21 = vpop.eup %2916 }
0x107a   :  { %v1539_v55 = vpop.permute.xlu1 %1538 }
0x107b   :  { %v1541_v25 = vmul.f32 %v2917_v21, %v1539_v55  ;;  %v1904_v21 = vld [vmem:[%s4029_s0 + $0x27] sm:$0x1]  ;;  %v1905_v55 = vld [vmem:[%s4029_s0 + $0x2f] sm:$0x1] }
0x107d   :  { %1542 = vst.msk [vmem:[#allocation3] sm:$0xff] %vm294_vm13, %v1541_v25  ;;  %1683 = vrot.lane.b32.xlu1 %v1541_v25, %s3056_s9  ;;  %v1545_v26 = vpop.permute.xlu0 %1544 }
0x107e   :  { %1547 = vst.msk [vmem:[#allocation3] sm:$0xff] %vm296_vm14, %v1545_v26 }
0x1085   :  { %v1548_v7 = vld [vmem:[#allocation3] sm:$0xff] }
0x1086   :  { %1614 = vmatmul.mubr.f32.vlgmr.msra.gmra.mrb[10].mxu1 %v1548_v7  ;;  %v1906_v7 = vld [vmem:[%s4029_s0 + $0x37] sm:$0x1] }
0x1087   :  { %2712 = vmatpush1.bf16.msra.mxu1 %v3157_v8  ;;  %2005 = vmatprep.mubr.f32.mxu1 %v3053_v0 }
0x1088   :  { %2714 = vmatprep.subr.bf16.mxu1 %v3159_v9 }
0x108b   :  { %2716 = vmatpush1.bf16.msra.mxu1 %v3175_v14 }
0x108c   :  { %2718 = vmatprep.subr.bf16.mxu1 %v3178_v15 }
0x108f   :  { %2720 = vmatpush1.bf16.msra.mxu1 %v3205_v24 }
0x1090   :  { %2722 = vmatprep.subr.bf16.mxu1 %v3217_v28 }
0x1093   :  { %2724 = vmatpush1.bf16.msra.mxu1 %v3236_v40 }
0x1094   :  { %2727 = vmatprep.subr.msk.bf16.mxu1 %vm3250_vm8, %v3240_v43 }
0x1097   :  { %2730 = vmatpush1.bf16.msk.msra.mxu1 %vm3250_vm8, %v3257_v51 }
0x1098   :  { %2732 = vmatprep.subr.bf16.mxu1 %v3306_v18 }
0x10ef   :  { %v1684_v8 = vpop.permute.xlu1 %1683 }
0x10f0   :  { %1686 = vst.msk [vmem:[#allocation2] sm:$0xff] %vm179_vm11, %v1684_v8  ;;  %v1916_v8 = vrot.slane %v1901_v1, 7 }
0x10f7   :  { %v1687_v9 = vld [vmem:[#allocation2] sm:$0xff] }
0x10f8   :  { %2289 = vmatmul.mubr.msk.f32.vlgmr.msra.gmra.mrb[12].mxu0 %vm182_vm12, %v1687_v9  ;;  %v1918_v9 = vrot.slane %v1902_v19, 6 }
0x10f9   :  { %2680 = vmatpush1.bf16.msra.mxu0 %v3308_v22  ;;  %1863 = vmatprep.mubr.f32.mxu0 %v3053_v0 }
0x10fa   :  { %2682 = vmatprep.subr.bf16.mxu0 %v3310_v23 }
0x10fd   :  { %2684 = vmatpush1.bf16.msra.mxu0 %v3314_v30 }
0x10fe   :  { %2686 = vmatprep.subr.bf16.mxu0 %v3317_v31 }
0x1101   :  { %2688 = vmatpush1.bf16.msra.mxu0 %v3320_v36 }
0x1102   :  { %2690 = vmatprep.subr.bf16.mxu0 %v3323_v37 }
0x1105   :  { %2692 = vmatpush1.bf16.msra.mxu0 %v3326_v44 }
0x1106   :  { %2694 = vmatprep.subr.bf16.mxu0 %v3329_v45 }
0x1109   :  { %2696 = vmatpush1.bf16.msra.mxu0 %v3332_v52 }
0x110a   :  { %2698 = vmatprep.subr.bf16.mxu0 %v3335_v53 }
0x110d   :  { %2700 = vmatpush1.bf16.msra.mxu0 %v3339_v60 }
0x110e   :  { %2702 = vmatprep.subr.bf16.mxu0 %v3344_v6 }
0x1111   :  { %2704 = vmatpush1.bf16.msra.mxu0 %v3347_v12 }
0x1112   :  { %2706 = vmatprep.subr.bf16.mxu0 %v3351_v17 }
0x1115   :  { %2708 = vmatpush1.bf16.msra.mxu0 %v3353_v20 }
0x1159   :  { %v1615_v14 = vpop.f32.mrb[10].mxu1 }
0x115a   :  { %v1617_v15 = vpop.f32.mrb[11].mxu1  ;;  %v1616_v40 = vadd.f32 %v1615_v14, %v3438_v35 }
0x115b   :  { %v1618_v24 = vadd.f32 %v1617_v15, %v3432_v27  ;;  %v1907_v15 = vld [vmem:[%s4029_s0 + $0x3f] sm:$0x1] }
0x115c   :  { %v2285_v43 = vmul.f32 -1.442695, %v1616_v40 }
0x115d   :  { %2918 = vtanh.f32 %v1618_v24  ;;  %v2286_v61 = vmul.f32 -1.442695, %v1618_v24  ;;  %v1920_v24 = vrot.slane %v1903_v33, 5 }
0x115e   :  { %2920 = vpow2.f32 %v2285_v43  ;;  %v1924_v43 = vrot.slane %v1905_v55, 3 }
0x1167   :  { %v2919_v28 = vpop.eup %2918 }
0x1168   :  { %1635 = vrot.lane.b32.xlu0 %v2919_v28, %s3055_s1  ;;  %v2921_v48 = vpop.eup %2920  ;;  %v1922_v28 = vrot.slane %v1904_v21, 4 }
0x1169   :  { %v1626_v18 = vadd.f32 1.0, %v2921_v48 }
0x11cb   :  { %v1757_v51 = vpop.f32.mrb[12].mxu0 }
0x11cc   :  { %v1759_v57 = vpop.f32.mrb[13].mxu0  ;;  %v1758_v41 = vadd.f32 %v1757_v51, %v3302_v2  ;;  %v1926_v51 = vrot.slane %v1906_v7, 2 }
0x11cd   :  { %v3900_v32 = vadd.f32 %v1759_v57, %v3292_v59  ;;  %v1928_v57 = vrot.slane %v1907_v15, 1 }
0x11ce   :  { %v2290_v13 = vmul.f32 -1.442695, %v1758_v41 }
0x11cf   :  { %2922 = vtanh.f32 %v3900_v32  ;;  %v2291_v41 = vmul.f32 -1.442695, %v3900_v32 }
0x11d0   :  { %2924 = vrcp.f32 %v1626_v18 }
0x11d1   :  { %2926 = vpow2.f32 %v2290_v13 }
0x11d9   :  { %v2923_v63 = vpop.eup %2922 }
0x11da   :  { %v2925_v38 = vpop.eup %2924  ;;  %1777 = vrot.lane.b32.xlu1 %v2923_v63, %s3055_s1  ;;  %v1636_v47 = vpop.permute.xlu0 %1635 }
0x11db   :  { %v1638_v39 = vmul.f32 %v2925_v38, %v1636_v47  ;;  %v2927_v4 = vpop.eup %2926  ;;  %v1633_v56 = vmul.f32 %v2925_v38, %v3817_v46  ;;  %v1900_v46 = vld [vmem:[%s4029_s0 + $0x7] sm:$0x1] }
0x11dc   :  { %v1768_v29 = vadd.f32 1.0, %v2927_v4  ;;  %v1917_v40 = vsel %vm156_vm1, %v1916_v8, %v1900_v46 }
0x11dd   :  { %1640 = vrot.lane.b32.xlu0 %v1638_v39, %s3055_s1  ;;  %v1919_v48 = vsel %vm159_vm2, %v1918_v9, %v1917_v40 }
0x11de   :  { %2928 = vrcp.f32 %v1768_v29  ;;  %v1921_v18 = vsel %vm162_vm3, %v1920_v24, %v1919_v48 }
0x11df   :  { %v1923_v63 = vsel %vm165_vm4, %v1922_v28, %v1921_v18 }
0x11e0   :  { %v1925_v38 = vsel %vm168_vm5, %v1924_v43, %v1923_v63 }
0x11e1   :  { %v1927_v47 = vsel %vm171_vm6, %v1926_v51, %v1925_v38 }
0x11e2   :  { %v1929_v39 = vsel %vm174_vm9, %v1928_v57, %v1927_v47 }
0x11e3   :  { %1931 = vst.msk [vmem:[#allocation2] sm:$0xff] %vm177_vm10, %v1929_v39 }
0x11e8   :  { %v2929_v49 = vpop.eup %2928 }
0x11e9   :  { %v1775_v3 = vmul.f32 %v2929_v49, %v3822_v62 }
0x124c   :  { %v1778_v58 = vpop.permute.xlu1 %1777 }
0x124d   :  { %v1780_v50 = vmul.f32 %v2929_v49, %v1778_v58 }
0x124f   :  { %1782 = vrot.lane.b32.xlu1 %v1780_v50, %s3055_s1  ;;  %v1641_v34 = vpop.permute.xlu0 %1640 }
0x1250   :  { %v3908_v54 = vadd.f32 %v1641_v34, %v1633_v56 }
0x1252   :  { %2930 = vtanh.f32 %v3908_v54 }
0x1253   :  { %2932 = vpow2.f32 %v2286_v61 }
0x125c   :  { %v2931_v42 = vpop.eup %2930 }
0x125d   :  { %1646 = vrot.lane.b32.xlu0 %v2931_v42, %s3055_s1  ;;  %v2933_v16 = vpop.eup %2932 }
0x125e   :  { %v1627_v5 = vadd.f32 1.0, %v2933_v16 }
0x12c1   :  { %v1783_v10 = vpop.permute.xlu1 %1782 }
0x12c2   :  { %v3913_v11 = vadd.f32 %v1783_v10, %v1775_v3 }
0x12c4   :  { %2934 = vtanh.f32 %v3913_v11 }
0x12c5   :  { %2936 = vrcp.f32 %v1627_v5 }
0x12c6   :  { %2938 = vpow2.f32 %v2291_v41 }
0x12ce   :  { %v2935_v62 = vpop.eup %2934 }
0x12cf   :  { %v2937_v25 = vpop.eup %2936  ;;  %1788 = vrot.lane.b32.xlu1 %v2935_v62, %s3055_s1  ;;  %v1647_v26 = vpop.permute.xlu0 %1646 }
0x12d0   :  { %v1649_v14 = vmul.f32 %v2937_v25, %v1647_v26  ;;  %v2939_v13 = vpop.eup %2938 }
0x12d1   :  { %v1769_v4 = vadd.f32 1.0, %v2939_v13 }
0x12d2   :  { %1794 = vrot.lane.b32.xlu0 %v1649_v14, %s3055_s1 }
0x12d3   :  { %2940 = vrcp.f32 %v1769_v4 }
0x12dd   :  { %v2941_v29 = vpop.eup %2940 }
0x1341   :  { %v1789_v49 = vpop.permute.xlu1 %1788 }
0x1342   :  { %v1791_v58 = vmul.f32 %v2941_v29, %v1789_v49  ;;  %v2151_v49 = vld [vmem:[%s4034_s5 + $0x8] sm:$0xff] }
0x1344   :  { %1792 = vst.msk [vmem:[#allocation3] sm:$0xff] %vm294_vm13, %v1791_v58  ;;  %1933 = vrot.lane.b32.xlu1 %v1791_v58, %s3056_s9  ;;  %v1795_v50 = vpop.permute.xlu0 %1794  ;;  %v3057_v58 = vmov 0.0|0.0  }
0x1345   :  { %1797 = vst.msk [vmem:[#allocation3] sm:$0xff] %vm296_vm14, %v1795_v50  ;;  %2763 = vmatprep.subr.bf16.mxu0 %v3057_v58 }
0x134c   :  { %v1798_v56 = vld [vmem:[#allocation3] sm:$0xff] }
0x134d   :  { %1864 = vmatmul.mubr.f32.vlgmr.msra.gmra.mrb[14].mxu0 %v1798_v56  ;;  %v2153_v56 = vld [vmem:[%s4034_s5 + $0x18] sm:$0xff] }
0x134e   :  { %2328 = vmatprep.mubr.msk.f32.mxu0 %vm3058_vm15, %v3053_v0 }
0x13b6   :  { %v1934_v34 = vpop.permute.xlu1 %1933 }
0x13b7   :  { %1936 = vst.msk [vmem:[#allocation2] sm:$0xff] %vm179_vm11, %v1934_v34 }
0x13be   :  { %v1937_v32 = vld [vmem:[#allocation2] sm:$0xff] }
0x13bf   :  { %2296 = vmatmul.mubr.msk.f32.vlgmr.msra.gmra.mrb[12].mxu1 %vm182_vm12, %v1937_v32  ;;  %v2154_v32 = vld [vmem:[%s4034_s5 + $0x20] sm:$0xff] }
0x13c0   :  { %2734 = vmatpush1.bf16.msra.mxu1 %v3308_v22  ;;  %2113 = vmatprep.mubr.f32.mxu1 %v3053_v0 }
0x13c1   :  { %2736 = vmatprep.subr.bf16.mxu1 %v3310_v23 }
0x13c4   :  { %2738 = vmatpush1.bf16.msra.mxu1 %v3314_v30 }
0x13c5   :  { %2740 = vmatprep.subr.bf16.mxu1 %v3317_v31 }
0x13c8   :  { %2742 = vmatpush1.bf16.msra.mxu1 %v3320_v36 }
0x13c9   :  { %2744 = vmatprep.subr.bf16.mxu1 %v3323_v37 }
0x13cc   :  { %2746 = vmatpush1.bf16.msra.mxu1 %v3326_v44 }
0x13cd   :  { %2748 = vmatprep.subr.bf16.mxu1 %v3329_v45 }
0x13d0   :  { %2750 = vmatpush1.bf16.msra.mxu1 %v3332_v52 }
0x13d1   :  { %2752 = vmatprep.subr.bf16.mxu1 %v3335_v53 }
0x13d4   :  { %2754 = vmatpush1.bf16.msra.mxu1 %v3339_v60 }
0x13d5   :  { %2756 = vmatprep.subr.bf16.mxu1 %v3344_v6 }
0x13d8   :  { %2758 = vmatpush1.bf16.msra.mxu1 %v3347_v12 }
0x13d9   :  { %2760 = vmatprep.subr.bf16.mxu1 %v3351_v17 }
0x13dc   :  { %2762 = vmatpush1.bf16.msra.mxu1 %v3353_v20 }
0x1420   :  { %v1865_v22 = vpop.f32.mrb[14].mxu0 }
0x1421   :  { %v1867_v23 = vpop.f32.mrb[15].mxu0  ;;  %v1866_v36 = vadd.f32 %v1865_v22, %v3438_v35  ;;  %v2155_v22 = vld [vmem:[%s4034_s5 + $0x28] sm:$0xff] }
0x1422   :  { %v1868_v30 = vadd.f32 %v1867_v23, %v3432_v27  ;;  %v2770_v23 = vpack.c.bf16 %v2155_v22, %v2154_v32 }
0x1423   :  { %v2292_v37 = vmul.f32 -1.442695, %v1866_v36 }
0x1424   :  { %2942 = vtanh.f32 %v1868_v30 }
0x1425   :  { %2944 = vpow2.f32 %v2292_v37 }
0x142e   :  { %v2943_v31 = vpop.eup %2942 }
0x142f   :  { %1885 = vrot.lane.b32.xlu0 %v2943_v31, %s3055_s1  ;;  %v2945_v44 = vpop.eup %2944  ;;  %v2157_v31 = vld [vmem:[%s4034_s5 + $0x38] sm:$0xff] }
0x1430   :  { %v1876_v52 = vadd.f32 1.0, %v2945_v44 }
0x1492   :  { %v2007_v45 = vpop.f32.mrb[12].mxu1 }
0x1493   :  { %v2009_v53 = vpop.f32.mrb[13].mxu1  ;;  %v2008_v42 = vadd.f32 %v2007_v45, %v3302_v2  ;;  %v2293_v2 = vmul.f32 -1.442695, %v1868_v30  ;;  %v2156_v30 = vld [vmem:[%s4034_s5 + $0x30] sm:$0xff] }
0x1494   :  { %v2010_v60 = vadd.f32 %v2009_v53, %v3292_v59  ;;  %v2773_v36 = vpack.c.bf16 %v2157_v31, %v2156_v30 }
0x1495   :  { %v2297_v61 = vmul.f32 -1.442695, %v2008_v42  ;;  %v2301_v42 = vld [vmem:[%s4035_s6] ss:$0 sm:$0xff] }
0x1496   :  { %2946 = vtanh.f32 %v2010_v60  ;;  %v2298_v14 = vmul.f32 -1.442695, %v2010_v60 }
0x1497   :  { %2948 = vrcp.f32 %v1876_v52 }
0x1498   :  { %2950 = vpow2.f32 %v2297_v61 }
0x14a0   :  { %v2947_v6 = vpop.eup %2946 }
0x14a1   :  { %v2949_v12 = vpop.eup %2948  ;;  %2027 = vrot.lane.b32.xlu1 %v2947_v6, %s3055_s1  ;;  %v1886_v17 = vpop.permute.xlu0 %1885 }
0x14a2   :  { %v1888_v20 = vmul.f32 %v2949_v12, %v1886_v17  ;;  %v2951_v16 = vpop.eup %2950  ;;  %v1883_v46 = vmul.f32 %v2949_v12, %v3908_v54 }
0x14a3   :  { %v2018_v3 = vadd.f32 1.0, %v2951_v16 }
0x14a4   :  { %1890 = vrot.lane.b32.xlu0 %v1888_v20, %s3055_s1 }
0x14a5   :  { %2952 = vrcp.f32 %v2018_v3 }
0x14af   :  { %v2953_v5 = vpop.eup %2952 }
0x14b0   :  { %v2025_v21 = vmul.f32 %v2953_v5, %v3913_v11 }
0x1513   :  { %v2028_v10 = vpop.permute.xlu1 %2027 }
0x1514   :  { %v2030_v59 = vmul.f32 %v2953_v5, %v2028_v10 }
0x1516   :  { %2032 = vrot.lane.b32.xlu1 %v2030_v59, %s3055_s1  ;;  %v1891_v1 = vpop.permute.xlu0 %1890 }
0x1517   :  { %v3981_v19 = vadd.f32 %v1891_v1, %v1883_v46 }
0x1519   :  { %2954 = vtanh.f32 %v3981_v19 }
0x151a   :  { %2956 = vpow2.f32 %v2293_v2 }
0x1523   :  { %v2955_v62 = vpop.eup %2954 }
0x1524   :  { %1896 = vrot.lane.b32.xlu0 %v2955_v62, %s3055_s1  ;;  %v2957_v33 = vpop.eup %2956 }
0x1525   :  { %v1877_v55 = vadd.f32 1.0, %v2957_v33 }
0x1588   :  { %v2033_v25 = vpop.permute.xlu1 %2032 }
0x1589   :  { %v2035_v26 = vadd.f32 %v2033_v25, %v2025_v21 }
0x158b   :  { %2958 = vtanh.f32 %v2035_v26 }
0x158c   :  { %2960 = vrcp.f32 %v1877_v55 }
0x158d   :  { %2962 = vpow2.f32 %v2298_v14 }
0x1595   :  { %v2959_v54 = vpop.eup %2958 }
0x1596   :  { %v2961_v7 = vpop.eup %2960  ;;  %2038 = vrot.lane.b32.xlu1 %v2959_v54, %s3055_s1  ;;  %v1897_v8 = vpop.permute.xlu0 %1896 }
0x1597   :  { %v1899_v9 = vmul.f32 %v2961_v7, %v1897_v8  ;;  %v2963_v15 = vpop.eup %2962 }
0x1598   :  { %v2019_v24 = vadd.f32 1.0, %v2963_v15 }
0x1599   :  { %2044 = vrot.lane.b32.xlu0 %v1899_v9, %s3055_s1 }
0x159a   :  { %2964 = vrcp.f32 %v2019_v24 }
0x15a4   :  { %v2965_v28 = vpop.eup %2964 }
0x1608   :  { %v2039_v11 = vpop.permute.xlu1 %2038 }
0x1609   :  { %v2041_v40 = vmul.f32 %v2965_v28, %v2039_v11 }
0x160b   :  { %2042 = vst.msk [vmem:[#allocation3] sm:$0xff] %vm294_vm13, %v2041_v40  ;;  %v2045_v43 = vpop.permute.xlu0 %2044 }
0x160c   :  { %2047 = vst.msk [vmem:[#allocation3] sm:$0xff] %vm296_vm14, %v2045_v43 }
0x1613   :  { %v2048_v48 = vld [vmem:[#allocation3] sm:$0xff] }
0x1614   :  { %2114 = vmatmul.mubr.f32.vlgmr.msra.gmra.mrb[14].mxu1 %v2048_v48 }
0x16e7   :  { %v2115_v51 = vpop.f32.mrb[14].mxu1 }
0x16e8   :  { %v2117_v18 = vpop.f32.mrb[15].mxu1  ;;  %v2116_v38 = vadd.f32 %v2115_v51, %v3438_v35  ;;  %v2152_v35 = vld [vmem:[%s4034_s5 + $0x10] sm:$0xff] }
0x16e9   :  { %v2118_v57 = vadd.f32 %v2117_v18, %v3432_v27  ;;  %v2150_v27 = vld [vmem:[%s4034_s5] sm:$0xff]  ;;  %v2767_v34 = vpack.c.bf16 %v2153_v56, %v2152_v35 }
0x16ea   :  { %v2299_v47 = vmul.f32 -1.442695, %v2116_v38  ;;  %v2764_v50 = vpack.c.bf16 %v2151_v49, %v2150_v27 }
0x16eb   :  { %2966 = vtanh.f32 %v2118_v57  ;;  %v2300_v53 = vmul.f32 -1.442695, %v2118_v57 }
0x16ec   :  { %2968 = vpow2.f32 %v2299_v47  ;;  %2765 = vmatpush3.bf16.msra.mxu0 %v2764_v50 }
0x16ed   :  { %2766 = vmatprep.subr.bf16.mxu0 %v3057_v58 }
0x16f0   :  { %2768 = vmatpush3.bf16.msra.mxu0 %v2767_v34 }
0x16f1   :  { %2769 = vmatprep.subr.bf16.mxu0 %v3057_v58 }
0x16f4   :  { %2771 = vmatpush3.bf16.msra.mxu0 %v2770_v23 }
0x16f5   :  { %v2967_v63 = vpop.eup %2966  ;;  %2772 = vmatprep.subr.bf16.mxu0 %v3057_v58 }
0x16f6   :  { %2135 = vrot.lane.b32.xlu1 %v2967_v63, %s3055_s1  ;;  %v2969_v39 = vpop.eup %2968 }
0x16f7   :  { %v2126_v41 = vadd.f32 1.0, %v2969_v39 }
0x16f8   :  { %2774 = vmatpush3.bf16.msra.mxu0 %v2773_v36 }
0x16f9   :  { %2970 = vrcp.f32 %v2126_v41 }
0x1703   :  { %v2971_v13 = vpop.eup %2970 }
0x1704   :  { %v2133_v37 = vmul.f32 %v2971_v13, %v3981_v19 }
0x1768   :  { %v2136_v4 = vpop.permute.xlu1 %2135 }
0x1769   :  { %v2138_v29 = vmul.f32 %v2971_v13, %v2136_v4 }
0x176b   :  { %2140 = vrot.lane.b32.xlu0 %v2138_v29, %s3055_s1 }
0x17dd   :  { %v2141_v44 = vpop.permute.xlu0 %2140 }
0x17de   :  { %v2143_v45 = vadd.f32 %v2141_v44, %v2133_v37 }
0x17e0   :  { %2972 = vtanh.f32 %v2143_v45 }
0x17e1   :  { %2974 = vpow2.f32 %v2300_v53 }
0x17ea   :  { %v2973_v52 = vpop.eup %2972 }
0x17eb   :  { %2146 = vrot.lane.b32.xlu1 %v2973_v52, %s3055_s1  ;;  %v2975_v60 = vpop.eup %2974 }
0x17ec   :  { %v2127_v6 = vadd.f32 1.0, %v2975_v60 }
0x17ee   :  { %2976 = vrcp.f32 %v2127_v6 }
0x17f8   :  { %v2977_v12 = vpop.eup %2976 }
0x185d   :  { %v2147_v17 = vpop.permute.xlu1 %2146 }
0x185e   :  { %v2149_v20 = vmul.f32 %v2977_v12, %v2147_v17 }
0x1860   :  { %2329 = vmatmul.mubr.msk.f32.vlgmr.msra.gmra.mrb[16].mxu0 %vm294_vm13, %v2149_v20 }
0x1933   :  { %v2234_v61 = vpop.f32.mrb[16].mxu0 }
0x1934   :  { %v2235_v0 = vadd.f32 %v2301_v42, %v2234_v61  ;;  %v2330_v16 = vpop.f32.mrb[17].mxu0 }
0x1936   :  { %2238 = vst.msk [vmem:[%s4036_s7] sm:$0xff] %vm177_vm10, %v2235_v0 }
0x1937   :  { %2243 = vsyncpa [#allocation5], 1 }
0x1938   :  { %2244 = vsyncpa [#allocation7], 1 }

</bundles_post_ra>
